<compile_context>
chip_gen: v6e
topology: v6e:2x2x1
jax: 0.10.0
libtpu: 0.0.40
codegen_flags: <defaults>
</compile_context>

<pallas_src>
import functools

import jax
import jax.numpy as jnp
from jax.experimental import pallas as pl
from jax.experimental.pallas import tpu as pltpu

MIN_F32 = float(jnp.finfo(jnp.float32).min)  # matches torch get_min_value(float32)


def _bert_self_attention_kernel(x_ref, mask_ref, w3_ref, b3_ref, out_ref,
                                q_scr, k_scr, v_scr,
                                *, num_heads, head_size, q_tile):
    """Grid = (batch, q_tile). One step = one (batch, query-tile) pair.

    x_ref    : (1, S, hidden)   compute dtype (bf16 or f32), constant along q
    mask_ref : (1, 1, S)        f32 {0,1}, constant along q
    w3_ref   : (hidden, 3*A)    compute dtype, fused [Wq | Wk | Wv], grid-invariant
    b3_ref   : (1, 3*A)         f32,          fused [bq | bk | bv], grid-invariant
    out_ref  : (1, tq, A)       out dtype
    q_scr/k_scr/v_scr : (H, S, d) compute dtype, persistent per-batch scratch
    """
    H, d = num_heads, head_size
    A = H * d
    S = x_ref.shape[1]
    qi = pl.program_id(1)

    # ---- Once per batch element: fused QKV projection over the whole
    # sequence (one large well-shaped MXU matmul, f32 accumulation), then one
    # reshape+transpose per tensor into head-major (H, S, d) scratch.
    @pl.when(qi == 0)
    def _():
        x = x_ref[0]                                               # (S, hidden)
        qkv = jnp.dot(x, w3_ref[...], preferred_element_type=jnp.float32)
        qkv = (qkv + b3_ref[...]).astype(q_scr.dtype)              # (S, 3A)
        q_scr[...] = qkv[:, 0 * A:1 * A].reshape(S, H, d).transpose(1, 0, 2)
        k_scr[...] = qkv[:, 1 * A:2 * A].reshape(S, H, d).transpose(1, 0, 2)
        v_scr[...] = qkv[:, 2 * A:3 * A].reshape(S, H, d).transpose(1, 0, 2)

    # ---- Per query tile: (H, tq, S) scores only.
    q_start = pl.multiple_of(qi * q_tile, q_tile)
    q3 = q_scr[:, pl.ds(q_start, q_tile), :]                       # (H, tq, d)
    k3 = k_scr[...]                                                # (H, S, d)
    v3 = v_scr[...]                                                # (H, S, d)

    # Additive key mask (same semantics as the module: scores + (~m)*f32.min).
    neg = (1.0 - mask_ref[0]) * MIN_F32                            # (1, S)

    # NOTE: no 1/sqrt(d) scaling — matches the PyTorch module.
    # Fused mask-add / max-subtract / exp keeps only one extra (H,tq,S) live.
    s = jnp.einsum("hqd,hkd->hqk", q3, k3,
                   preferred_element_type=jnp.float32) + neg[None, :, :]
    e = jnp.exp(s - jnp.max(s, axis=-1, keepdims=True))            # (H, tq, S) f32
    denom = jnp.sum(e, axis=-1, keepdims=True)                     # (H, tq, 1) f32

    # Deferred normalization: PV matmul on un-normalized exponentials (bf16
    # MXU input is safe, e in [0,1]), then one f32 scale on (H, tq, d).
    ctx = jnp.einsum("hqk,hkd->hqd", e.astype(v3.dtype), v3,
                     preferred_element_type=jnp.float32)           # (H, tq, d)
    ctx = ctx * pl.reciprocal(denom, approx=True)                  # EUP slot

    # Single lane-dense store of the (tq, A) slab.
    out_ref[0] = ctx.transpose(1, 0, 2).reshape(q_tile, A).astype(out_ref.dtype)


def _pick_q_tile(S):
    # Default cap at 128: keeps per-step (H,tq,S) intermediates small on all
    # generations. Raise via the q_tile argument on v6e (128 MiB VMEM).
    for t in (128, 64, 32, 16, 8):
        if S % t == 0:
            return t
    return S


def _default_vmem_limit(S, hidden, A, H, d, tq, c_bytes, o_bytes):
    est = (
        2 * S * hidden * c_bytes          # x block (double-buffered)
        + 2 * S * 4                       # mask block
        + 2 * hidden * 3 * A * c_bytes    # fused weights (worst case: double)
        + 2 * 3 * A * 4                   # fused bias
        + 2 * tq * A * o_bytes            # output block (double-buffered)
        + 3 * H * S * d * c_bytes         # persistent Q/K/V scratch
        + S * 3 * A * (4 + c_bytes)       # qkv f32 + cast temporaries (q==0)
        + 2 * H * tq * S * 4              # scores + exp (f32)
        + H * tq * S * c_bytes            # exp cast for the PV matmul
        + 4 * H * tq * d * 4              # ctx + misc temporaries
    )
    # Clamp to 64 MiB so the request is valid on v7x; raise explicitly on v6e.
    return min(64 << 20, max(int(est * 1.5), 16 << 20))


def bert_self_attention(hidden_states, attention_mask,
                        wq, bq, wk, bk, wv, bv, num_heads,
                        *, compute_dtype=jnp.bfloat16, out_dtype=None,
                        q_tile=None, vmem_limit_bytes=None):
    """hidden_states: (B, S, hidden) f32; attention_mask: (B, S) f32 of {0,1}.
    Weights w*: (hidden, all_head_size); biases b*: (all_head_size,).
    compute_dtype controls the MXU input precision (accumulation is f32);
    out_dtype defaults to compute_dtype (halved HBM writeback for bf16).
    Returns the context layer of shape (B, S, all_head_size)."""
    B, S, hidden = hidden_states.shape
    all_head = wq.shape[1]
    head_size = all_head // num_heads
    assert head_size * num_heads == all_head

    if out_dtype is None:
        out_dtype = compute_dtype
    if q_tile is None:
        q_tile = _pick_q_tile(S)
    assert S % q_tile == 0, "q_tile must divide the sequence length"
    n_q = S // q_tile

    # Fused QKV parameters (glue, outside the kernel).
    w3 = jnp.concatenate([wq, wk, wv], axis=1).astype(compute_dtype)  # (hidden, 3A)
    b3 = jnp.concatenate([bq, bk, bv]).reshape(1, 3 * all_head).astype(jnp.float32)
    x = hidden_states.astype(compute_dtype)
    mask3 = attention_mask.reshape(B, 1, S).astype(jnp.float32)

    c_bytes = jnp.dtype(compute_dtype).itemsize
    o_bytes = jnp.dtype(out_dtype).itemsize
    if vmem_limit_bytes is None:
        vmem_limit_bytes = _default_vmem_limit(S, hidden, all_head, num_heads,
                                               head_size, q_tile, c_bytes, o_bytes)

    kernel = functools.partial(_bert_self_attention_kernel,
                               num_heads=num_heads, head_size=head_size,
                               q_tile=q_tile)

    cost = pl.CostEstimate(
        flops=(2 * B * S * hidden * 3 * all_head
               + 4 * B * num_heads * S * S * head_size),
        transcendentals=B * num_heads * S * S,
        bytes_accessed=(x.size * c_bytes + mask3.size * 4 + w3.size * c_bytes
                        + b3.size * 4 + B * S * all_head * o_bytes),
    )

    def run(single_buffer_weights):
        # Grid-invariant weights/bias: constant index_map, so they are fetched
        # once; with Buffered(1) they also hold only one VMEM copy.
        if single_buffer_weights:
            w3_spec = pl.BlockSpec((hidden, 3 * all_head), lambda b, q: (0, 0),
                                   pipeline_mode=pl.Buffered(1))
            b3_spec = pl.BlockSpec((1, 3 * all_head), lambda b, q: (0, 0),
                                   pipeline_mode=pl.Buffered(1))
        else:
            w3_spec = pl.BlockSpec((hidden, 3 * all_head), lambda b, q: (0, 0))
            b3_spec = pl.BlockSpec((1, 3 * all_head), lambda b, q: (0, 0))

        grid_spec = pltpu.PrefetchScalarGridSpec(
            num_scalar_prefetch=0,
            grid=(B, n_q),
            in_specs=[
                pl.BlockSpec((1, S, hidden), lambda b, q: (b, 0, 0)),  # x (per batch)
                pl.BlockSpec((1, 1, S), lambda b, q: (b, 0, 0)),       # mask (per batch)
                w3_spec,                                               # fused W
                b3_spec,                                               # fused b
            ],
            out_specs=pl.BlockSpec((1, q_tile, all_head), lambda b, q: (b, q, 0)),
            scratch_shapes=[
                pltpu.VMEM((num_heads, S, head_size), compute_dtype),  # Q
                pltpu.VMEM((num_heads, S, head_size), compute_dtype),  # K
                pltpu.VMEM((num_heads, S, head_size), compute_dtype),  # V
            ],
        )
        return pl.pallas_call(
            kernel,
            out_shape=jax.ShapeDtypeStruct((B, S, all_head), out_dtype),
            grid_spec=grid_spec,
            compiler_params=pltpu.CompilerParams(
                # Batch axis shards across v7x's two TensorCores; q axis must
                # stay sequential (reuses the per-batch K/V scratch).
                dimension_semantics=("parallel", "arbitrary"),
                vmem_limit_bytes=int(vmem_limit_bytes)),
            cost_estimate=cost,
        )(x, mask3, w3, b3)

    try:
        return run(True)
    except Exception:
        # pl.Buffered(1) single-buffering not supported by this JAX version:
        # fall back to default double-buffered grid-invariant weights.
        return run(False)


def _reference(hidden_states, attention_mask, wq, bq, wk, bk, wv, bv, num_heads):
    """Pure-JAX f32 reference reproducing the PyTorch forward (eval mode)."""
    B, S, hidden = hidden_states.shape
    all_head = wq.shape[1]
    d = all_head // num_heads

    def proj(w, b):
        y = hidden_states @ w + b                                    # (B, S, A)
        return y.reshape(B, S, num_heads, d).transpose(0, 2, 1, 3)   # (B, H, S, d)

    q, k, v = proj(wq, bq), proj(wk, bk), proj(wv, bv)
    scores = jnp.einsum("bhqd,bhkd->bhqk", q, k)                     # no 1/sqrt(d)
    neg = (1.0 - attention_mask)[:, None, None, :] * MIN_F32
    probs = jax.nn.softmax(scores + neg, axis=-1)
    ctx = jnp.einsum("bhqk,bhkd->bhqd", probs, v)
    return ctx.transpose(0, 2, 1, 3).reshape(B, S, all_head)


if __name__ == "__main__":
    B, S, hidden = 2, 8, 32
    num_heads = 4
    all_head = hidden  # attention_head_size = hidden / num_heads = 8

    key = jax.random.PRNGKey(0)
    ks = jax.random.split(key, 8)

    x = jax.random.normal(ks[0], (B, S, hidden), dtype=jnp.float32)

    # Deterministic parameter init (synthetic; shapes from nn.Linear(hidden, all_head)).
    scale = 0.05
    wq = scale * jax.random.normal(ks[1], (hidden, all_head), dtype=jnp.float32)
    wk = scale * jax.random.normal(ks[2], (hidden, all_head), dtype=jnp.float32)
    wv = scale * jax.random.normal(ks[3], (hidden, all_head), dtype=jnp.float32)
    bq = scale * jax.random.normal(ks[4], (all_head,), dtype=jnp.float32)
    bk = scale * jax.random.normal(ks[5], (all_head,), dtype=jnp.float32)
    bv = scale * jax.random.normal(ks[6], (all_head,), dtype=jnp.float32)

    # Attention mask: batch 0 fully visible, batch 1 has the last 2 tokens masked.
    attention_mask = jnp.ones((B, S), dtype=jnp.float32)
    attention_mask = attention_mask.at[1, -2:].set(0.0)

    ref = _reference(x, attention_mask, wq, bq, wk, bk, wv, bv, num_heads)

    # f32 MXU path (tolerance loosened slightly because the softmax denominator
    # uses the approximate EUP reciprocal on all paths).
    out_f32 = bert_self_attention(x, attention_mask, wq, bq, wk, bk, wv, bv,
                                  num_heads, compute_dtype=jnp.float32,
                                  out_dtype=jnp.float32)
    out_f32 = jax.block_until_ready(out_f32)
    assert out_f32.shape == (B, S, all_head)
    assert jnp.allclose(out_f32, ref, atol=1e-2, rtol=1e-2), "f32 mismatch vs reference"

    # Fast path: bf16 MXU inputs, f32 accumulation, bf16 output.
    out_bf16 = bert_self_attention(x, attention_mask, wq, bq, wk, bk, wv, bv,
                                   num_heads, compute_dtype=jnp.bfloat16)
    out_bf16 = jax.block_until_ready(out_bf16)
    assert out_bf16.shape == (B, S, all_head)
    assert out_bf16.dtype == jnp.bfloat16
    assert jnp.allclose(out_bf16.astype(jnp.float32), ref,
                        atol=3e-2, rtol=3e-2), "bf16 mismatch vs reference"

    print("KERNEL_OK")
</pallas_src>

<mosaic_0001>
module attributes {stable_mosaic.version = 11 : i64} {
  func.func @_bert_self_attention_kernel(%arg0: i32, %arg1: i32, %arg2: memref<1x8x32xf32, #tpu.memory_space<vmem>>, %arg3: memref<1x1x8xf32, #tpu.memory_space<vmem>>, %arg4: memref<32x96xf32, #tpu.memory_space<vmem>>, %arg5: memref<1x96xf32, #tpu.memory_space<vmem>>, %arg6: memref<1x8x32xf32, #tpu.memory_space<vmem>>, %arg7: memref<4x8x8xf32, #tpu.memory_space<vmem>>, %arg8: memref<4x8x8xf32, #tpu.memory_space<vmem>>, %arg9: memref<4x8x8xf32, #tpu.memory_space<vmem>>) attributes {dimension_semantics = [#tpu.dimension_semantics<parallel>, #tpu.dimension_semantics<arbitrary>], iteration_bounds = array<i64: 2, 1>, scalar_prefetch = 0 : i64, scratch_operands = 3 : i64, tpu.core_type = #tpu.core_type<tc>, window_params = [{transform_indices = @transform_0, window_bounds = array<i64: 1, 8, 32>}, {transform_indices = @transform_1, window_bounds = array<i64: 1, 1, 8>}, {pipeline_mode = #tpu.pipeline_mode<synchronous>, transform_indices = @transform_2, window_bounds = array<i64: 32, 96>}, {pipeline_mode = #tpu.pipeline_mode<synchronous>, transform_indices = @transform_3, window_bounds = array<i64: 1, 96>}, {transform_indices = @transform_4, window_bounds = array<i64: 1, 8, 32>}]} {
    %c0_i32 = arith.constant 0 : i32
    %0 = arith.cmpi eq, %arg1, %c0_i32 : i32
    %1 = arith.extui %0 : i1 to i32
    %c0_i32_0 = arith.constant 0 : i32
    %2 = arith.cmpi ne, %1, %c0_i32_0 : i32
    scf.if %2 {
      %c0_19 = arith.constant 0 : index
      %c0_20 = arith.constant 0 : index
      %c0_21 = arith.constant 0 : index
      %35 = vector.load %arg2[%c0_19, %c0_20, %c0_21] : memref<1x8x32xf32, #tpu.memory_space<vmem>>, vector<1x8x32xf32>
      %36 = vector.shape_cast %35 : vector<1x8x32xf32> to vector<8x32xf32>
      %c0_22 = arith.constant 0 : index
      %c0_23 = arith.constant 0 : index
      %37 = vector.load %arg4[%c0_22, %c0_23] : memref<32x96xf32, #tpu.memory_space<vmem>>, vector<32x96xf32>
      %cst_24 = arith.constant dense<0.000000e+00> : vector<8x96xf32>
      %38 = tpu.matmul %36, %37, %cst_24 {dimension_numbers = #tpu.dot_dimension_numbers<[1], [0], [0], [1], [0, 0, 1, 1], [], []>} : vector<8x32xf32>, vector<32x96xf32>, vector<8x96xf32> -> vector<8x96xf32>
      %c0_25 = arith.constant 0 : index
      %c0_26 = arith.constant 0 : index
      %39 = vector.load %arg5[%c0_25, %c0_26] : memref<1x96xf32, #tpu.memory_space<vmem>>, vector<1x96xf32>
      %40 = vector.broadcast %39 : vector<1x96xf32> to vector<8x96xf32>
      %41 = arith.addf %38, %40 : vector<8x96xf32>
      %42 = vector.extract_strided_slice %41 {offsets = [0, 0], sizes = [8, 32], strides = [1, 1]} : vector<8x96xf32> to vector<8x32xf32>
      %43 = vector.shape_cast %42 : vector<8x32xf32> to vector<8x4x8xf32>
      %44 = tpu.transpose %43, [1, 0, 2] : vector<8x4x8xf32> -> vector<4x8x8xf32>
      %c0_27 = arith.constant 0 : index
      %c0_28 = arith.constant 0 : index
      %c0_29 = arith.constant 0 : index
      %45 = vector.load %arg7[%c0_27, %c0_28, %c0_29] : memref<4x8x8xf32, #tpu.memory_space<vmem>>, vector<4x8x8xf32>
      tpu.vector_store %arg7[%c0_27, %c0_28, %c0_29], %44 {strides = array<i32>} : memref<4x8x8xf32, #tpu.memory_space<vmem>>, vector<4x8x8xf32>,
      %46 = vector.extract_strided_slice %41 {offsets = [0, 32], sizes = [8, 32], strides = [1, 1]} : vector<8x96xf32> to vector<8x32xf32>
      %47 = vector.shape_cast %46 : vector<8x32xf32> to vector<8x4x8xf32>
      %48 = tpu.transpose %47, [1, 0, 2] : vector<8x4x8xf32> -> vector<4x8x8xf32>
      %c0_30 = arith.constant 0 : index
      %c0_31 = arith.constant 0 : index
      %c0_32 = arith.constant 0 : index
      %49 = vector.load %arg8[%c0_30, %c0_31, %c0_32] : memref<4x8x8xf32, #tpu.memory_space<vmem>>, vector<4x8x8xf32>
      tpu.vector_store %arg8[%c0_30, %c0_31, %c0_32], %48 {strides = array<i32>} : memref<4x8x8xf32, #tpu.memory_space<vmem>>, vector<4x8x8xf32>,
      %50 = vector.extract_strided_slice %41 {offsets = [0, 64], sizes = [8, 32], strides = [1, 1]} : vector<8x96xf32> to vector<8x32xf32>
      %51 = vector.shape_cast %50 : vector<8x32xf32> to vector<8x4x8xf32>
      %52 = tpu.transpose %51, [1, 0, 2] : vector<8x4x8xf32> -> vector<4x8x8xf32>
      %c0_33 = arith.constant 0 : index
      %c0_34 = arith.constant 0 : index
      %c0_35 = arith.constant 0 : index
      %53 = vector.load %arg9[%c0_33, %c0_34, %c0_35] : memref<4x8x8xf32, #tpu.memory_space<vmem>>, vector<4x8x8xf32>
      tpu.vector_store %arg9[%c0_33, %c0_34, %c0_35], %52 {strides = array<i32>} : memref<4x8x8xf32, #tpu.memory_space<vmem>>, vector<4x8x8xf32>,
    } else {
    }
    %c8_i32 = arith.constant 8 : i32
    %3 = arith.muli %arg1, %c8_i32 : i32
    %4 = tpu.assume_multiple %3, 8 : i32
    %c0 = arith.constant 0 : index
    %5 = arith.index_cast %4 : i32 to index
    %c0_1 = arith.constant 0 : index
    %6 = vector.load %arg7[%c0, %5, %c0_1] : memref<4x8x8xf32, #tpu.memory_space<vmem>>, vector<4x8x8xf32>
    %c0_2 = arith.constant 0 : index
    %c0_3 = arith.constant 0 : index
    %c0_4 = arith.constant 0 : index
    %7 = vector.load %arg8[%c0_2, %c0_3, %c0_4] : memref<4x8x8xf32, #tpu.memory_space<vmem>>, vector<4x8x8xf32>
    %c0_5 = arith.constant 0 : index
    %c0_6 = arith.constant 0 : index
    %c0_7 = arith.constant 0 : index
    %8 = vector.load %arg9[%c0_5, %c0_6, %c0_7] : memref<4x8x8xf32, #tpu.memory_space<vmem>>, vector<4x8x8xf32>
    %c0_8 = arith.constant 0 : index
    %c0_9 = arith.constant 0 : index
    %c0_10 = arith.constant 0 : index
    %9 = vector.load %arg3[%c0_8, %c0_9, %c0_10] : memref<1x1x8xf32, #tpu.memory_space<vmem>>, vector<1x1x8xf32>
    %10 = vector.shape_cast %9 : vector<1x1x8xf32> to vector<1x8xf32>
    %cst = arith.constant 1.000000e+00 : f32
    %11 = vector.broadcast %cst : f32 to vector<1x8xf32>
    %12 = arith.subf %11, %10 : vector<1x8xf32>
    %cst_11 = arith.constant -3.40282347E+38 : f32
    %13 = vector.broadcast %cst_11 : f32 to vector<1x8xf32>
    %14 = arith.mulf %12, %13 : vector<1x8xf32>
    "tpu.trace_start"() <{level = 10 : i32, message = "hqd,hkd->hqk"}> : () -> ()
    %cst_12 = arith.constant dense<0.000000e+00> : vector<4x8x8xf32>
    %15 = tpu.matmul %6, %7, %cst_12 {dimension_numbers = #tpu.dot_dimension_numbers<[2], [2], [1], [1], [0, 0, 0, 1, 1, 1], [0], [0]>} : vector<4x8x8xf32>, vector<4x8x8xf32>, vector<4x8x8xf32> -> vector<4x8x8xf32>
    "tpu.trace_stop"() : () -> ()
    %16 = vector.shape_cast %14 : vector<1x8xf32> to vector<1x1x8xf32>
    %17 = vector.broadcast %16 : vector<1x1x8xf32> to vector<4x8x8xf32>
    %18 = arith.addf %15, %17 : vector<4x8x8xf32>
    %cst_13 = arith.constant dense<0xFF800000> : vector<4x8xf32>
    %19 = vector.multi_reduction <maximumf>, %18, %cst_13 [2] : vector<4x8x8xf32> to vector<4x8xf32>
    %20 = vector.shape_cast %19 : vector<4x8xf32> to vector<4x8x1xf32>
    %21 = vector.broadcast %20 : vector<4x8x1xf32> to vector<4x8x8xf32>
    %22 = arith.subf %18, %21 : vector<4x8x8xf32>
    %23 = math.exp %22 : vector<4x8x8xf32>
    %cst_14 = arith.constant dense<0.000000e+00> : vector<4x8xf32>
    %24 = vector.multi_reduction <add>, %23, %cst_14 [2] : vector<4x8x8xf32> to vector<4x8xf32>
    %25 = vector.shape_cast %24 : vector<4x8xf32> to vector<4x8x1xf32>
    "tpu.trace_start"() <{level = 10 : i32, message = "hqk,hkd->hqd"}> : () -> ()
    %cst_15 = arith.constant dense<0.000000e+00> : vector<4x8x8xf32>
    %26 = tpu.matmul %23, %8, %cst_15 {dimension_numbers = #tpu.dot_dimension_numbers<[2], [1], [1], [2], [0, 0, 0, 1, 1, 2], [0], [0]>} : vector<4x8x8xf32>, vector<4x8x8xf32>, vector<4x8x8xf32> -> vector<4x8x8xf32>
    "tpu.trace_stop"() : () -> ()
    %27 = tpu.reciprocal %25 {approx = true} : vector<4x8x1xf32> -> vector<4x8x1xf32>
    %28 = vector.broadcast %27 : vector<4x8x1xf32> to vector<4x8x8xf32>
    %29 = arith.mulf %26, %28 : vector<4x8x8xf32>
    %30 = tpu.transpose %29, [1, 0, 2] : vector<4x8x8xf32> -> vector<8x4x8xf32>
    %31 = vector.shape_cast %30 : vector<8x4x8xf32> to vector<8x32xf32>
    %c0_16 = arith.constant 0 : index
    %c0_17 = arith.constant 0 : index
    %c0_18 = arith.constant 0 : index
    %32 = vector.load %arg6[%c0_16, %c0_17, %c0_18] : memref<1x8x32xf32, #tpu.memory_space<vmem>>, vector<1x8x32xf32>
    %33 = vector.shape_cast %32 : vector<1x8x32xf32> to vector<8x32xf32>
    %34 = vector.shape_cast %31 : vector<8x32xf32> to vector<1x8x32xf32>
    tpu.vector_store %arg6[%c0_16, %c0_17, %c0_18], %34 {strides = array<i32>} : memref<1x8x32xf32, #tpu.memory_space<vmem>>, vector<1x8x32xf32>,
    return
  }
  func.func @transform_0(%arg0: i32, %arg1: i32) -> (i32, i32, i32) {
    %c0_i32 = arith.constant 0 : i32
    %c0_i32_0 = arith.constant 0 : i32
    %c0_i32_1 = arith.constant 0 : i32
    return %arg0, %c0_i32, %c0_i32_0 : i32, i32, i32
  }
  func.func @transform_1(%arg0: i32, %arg1: i32) -> (i32, i32, i32) {
    %c0_i32 = arith.constant 0 : i32
    %c0_i32_0 = arith.constant 0 : i32
    %c0_i32_1 = arith.constant 0 : i32
    return %arg0, %c0_i32, %c0_i32_0 : i32, i32, i32
  }
  func.func @transform_2(%arg0: i32, %arg1: i32) -> (i32, i32) {
    %c0_i32 = arith.constant 0 : i32
    %c0_i32_0 = arith.constant 0 : i32
    %c0_i32_1 = arith.constant 0 : i32
    return %c0_i32, %c0_i32_0 : i32, i32
  }
  func.func @transform_3(%arg0: i32, %arg1: i32) -> (i32, i32) {
    %c0_i32 = arith.constant 0 : i32
    %c0_i32_0 = arith.constant 0 : i32
    %c0_i32_1 = arith.constant 0 : i32
    return %c0_i32, %c0_i32_0 : i32, i32
  }
  func.func @transform_4(%arg0: i32, %arg1: i32) -> (i32, i32, i32) {
    %c0_i32 = arith.constant 0 : i32
    %c0_i32_0 = arith.constant 0 : i32
    return %arg0, %arg1, %c0_i32 : i32, i32, i32
  }
}

module attributes {stable_mosaic.version = 11 : i64} {
  func.func @_bert_self_attention_kernel(%arg0: i32, %arg1: i32, %arg2: memref<1x8x32xf32, #tpu.memory_space<vmem>>, %arg3: memref<1x1x8xf32, #tpu.memory_space<vmem>>, %arg4: memref<32x96xf32, #tpu.memory_space<vmem>>, %arg5: memref<1x96xf32, #tpu.memory_space<vmem>>, %arg6: memref<1x8x32xf32, #tpu.memory_space<vmem>>, %arg7: memref<4x8x8xf32, #tpu.memory_space<vmem>>, %arg8: memref<4x8x8xf32, #tpu.memory_space<vmem>>, %arg9: memref<4x8x8xf32, #tpu.memory_space<vmem>>) attributes {dimension_semantics = [#tpu.dimension_semantics<parallel>, #tpu.dimension_semantics<arbitrary>], iteration_bounds = array<i64: 2, 1>, scalar_prefetch = 0 : i64, scratch_operands = 3 : i64, tpu.core_type = #tpu.core_type<tc>, window_params = [{transform_indices = @transform_0, window_bounds = array<i64: 1, 8, 32>}, {transform_indices = @transform_1, window_bounds = array<i64: 1, 1, 8>}, {pipeline_mode = #tpu.pipeline_mode<synchronous>, transform_indices = @transform_2, window_bounds = array<i64: 32, 96>}, {pipeline_mode = #tpu.pipeline_mode<synchronous>, transform_indices = @transform_3, window_bounds = array<i64: 1, 96>}, {transform_indices = @transform_4, window_bounds = array<i64: 1, 8, 32>}]} {
    %c0_i32 = arith.constant 0 : i32
    %0 = arith.cmpi eq, %arg1, %c0_i32 : i32
    %1 = arith.extui %0 : i1 to i32
    %c0_i32_0 = arith.constant 0 : i32
    %2 = arith.cmpi ne, %1, %c0_i32_0 : i32
    scf.if %2 {
      %c0_19 = arith.constant 0 : index
      %c0_20 = arith.constant 0 : index
      %c0_21 = arith.constant 0 : index
      %35 = vector.load %arg2[%c0_19, %c0_20, %c0_21] : memref<1x8x32xf32, #tpu.memory_space<vmem>>, vector<1x8x32xf32>
      %36 = vector.shape_cast %35 : vector<1x8x32xf32> to vector<8x32xf32>
      %c0_22 = arith.constant 0 : index
      %c0_23 = arith.constant 0 : index
      %37 = vector.load %arg4[%c0_22, %c0_23] : memref<32x96xf32, #tpu.memory_space<vmem>>, vector<32x96xf32>
      %cst_24 = arith.constant dense<0.000000e+00> : vector<8x96xf32>
      %38 = tpu.matmul %36, %37, %cst_24 {dimension_numbers = #tpu.dot_dimension_numbers<[1], [0], [0], [1], [0, 0, 1, 1], [], []>} : vector<8x32xf32>, vector<32x96xf32>, vector<8x96xf32> -> vector<8x96xf32>
      %c0_25 = arith.constant 0 : index
      %c0_26 = arith.constant 0 : index
      %39 = vector.load %arg5[%c0_25, %c0_26] : memref<1x96xf32, #tpu.memory_space<vmem>>, vector<1x96xf32>
      %40 = vector.broadcast %39 : vector<1x96xf32> to vector<8x96xf32>
      %41 = arith.addf %38, %40 : vector<8x96xf32>
      %42 = vector.extract_strided_slice %41 {offsets = [0, 0], sizes = [8, 32], strides = [1, 1]} : vector<8x96xf32> to vector<8x32xf32>
      %43 = vector.shape_cast %42 : vector<8x32xf32> to vector<8x4x8xf32>
      %44 = tpu.transpose %43, [1, 0, 2] : vector<8x4x8xf32> -> vector<4x8x8xf32>
      %c0_27 = arith.constant 0 : index
      %c0_28 = arith.constant 0 : index
      %c0_29 = arith.constant 0 : index
      %45 = vector.load %arg7[%c0_27, %c0_28, %c0_29] : memref<4x8x8xf32, #tpu.memory_space<vmem>>, vector<4x8x8xf32>
      tpu.vector_store %arg7[%c0_27, %c0_28, %c0_29], %44 {strides = array<i32>} : memref<4x8x8xf32, #tpu.memory_space<vmem>>, vector<4x8x8xf32>,
      %46 = vector.extract_strided_slice %41 {offsets = [0, 32], sizes = [8, 32], strides = [1, 1]} : vector<8x96xf32> to vector<8x32xf32>
      %47 = vector.shape_cast %46 : vector<8x32xf32> to vector<8x4x8xf32>
      %48 = tpu.transpose %47, [1, 0, 2] : vector<8x4x8xf32> -> vector<4x8x8xf32>
      %c0_30 = arith.constant 0 : index
      %c0_31 = arith.constant 0 : index
      %c0_32 = arith.constant 0 : index
      %49 = vector.load %arg8[%c0_30, %c0_31, %c0_32] : memref<4x8x8xf32, #tpu.memory_space<vmem>>, vector<4x8x8xf32>
      tpu.vector_store %arg8[%c0_30, %c0_31, %c0_32], %48 {strides = array<i32>} : memref<4x8x8xf32, #tpu.memory_space<vmem>>, vector<4x8x8xf32>,
      %50 = vector.extract_strided_slice %41 {offsets = [0, 64], sizes = [8, 32], strides = [1, 1]} : vector<8x96xf32> to vector<8x32xf32>
      %51 = vector.shape_cast %50 : vector<8x32xf32> to vector<8x4x8xf32>
      %52 = tpu.transpose %51, [1, 0, 2] : vector<8x4x8xf32> -> vector<4x8x8xf32>
      %c0_33 = arith.constant 0 : index
      %c0_34 = arith.constant 0 : index
      %c0_35 = arith.constant 0 : index
      %53 = vector.load %arg9[%c0_33, %c0_34, %c0_35] : memref<4x8x8xf32, #tpu.memory_space<vmem>>, vector<4x8x8xf32>
      tpu.vector_store %arg9[%c0_33, %c0_34, %c0_35], %52 {strides = array<i32>} : memref<4x8x8xf32, #tpu.memory_space<vmem>>, vector<4x8x8xf32>,
    } else {
    }
    %c8_i32 = arith.constant 8 : i32
    %3 = arith.muli %arg1, %c8_i32 : i32
    %4 = tpu.assume_multiple %3, 8 : i32
    %c0 = arith.constant 0 : index
    %5 = arith.index_cast %4 : i32 to index
    %c0_1 = arith.constant 0 : index
    %6 = vector.load %arg7[%c0, %5, %c0_1] : memref<4x8x8xf32, #tpu.memory_space<vmem>>, vector<4x8x8xf32>
    %c0_2 = arith.constant 0 : index
    %c0_3 = arith.constant 0 : index
    %c0_4 = arith.constant 0 : index
    %7 = vector.load %arg8[%c0_2, %c0_3, %c0_4] : memref<4x8x8xf32, #tpu.memory_space<vmem>>, vector<4x8x8xf32>
    %c0_5 = arith.constant 0 : index
    %c0_6 = arith.constant 0 : index
    %c0_7 = arith.constant 0 : index
    %8 = vector.load %arg9[%c0_5, %c0_6, %c0_7] : memref<4x8x8xf32, #tpu.memory_space<vmem>>, vector<4x8x8xf32>
    %c0_8 = arith.constant 0 : index
    %c0_9 = arith.constant 0 : index
    %c0_10 = arith.constant 0 : index
    %9 = vector.load %arg3[%c0_8, %c0_9, %c0_10] : memref<1x1x8xf32, #tpu.memory_space<vmem>>, vector<1x1x8xf32>
    %10 = vector.shape_cast %9 : vector<1x1x8xf32> to vector<1x8xf32>
    %cst = arith.constant 1.000000e+00 : f32
    %11 = vector.broadcast %cst : f32 to vector<1x8xf32>
    %12 = arith.subf %11, %10 : vector<1x8xf32>
    %cst_11 = arith.constant -3.40282347E+38 : f32
    %13 = vector.broadcast %cst_11 : f32 to vector<1x8xf32>
    %14 = arith.mulf %12, %13 : vector<1x8xf32>
    "tpu.trace_start"() <{level = 10 : i32, message = "hqd,hkd->hqk"}> : () -> ()
    %cst_12 = arith.constant dense<0.000000e+00> : vector<4x8x8xf32>
    %15 = tpu.matmul %6, %7, %cst_12 {dimension_numbers = #tpu.dot_dimension_numbers<[2], [2], [1], [1], [0, 0, 0, 1, 1, 1], [0], [0]>} : vector<4x8x8xf32>, vector<4x8x8xf32>, vector<4x8x8xf32> -> vector<4x8x8xf32>
    "tpu.trace_stop"() : () -> ()
    %16 = vector.shape_cast %14 : vector<1x8xf32> to vector<1x1x8xf32>
    %17 = vector.broadcast %16 : vector<1x1x8xf32> to vector<4x8x8xf32>
    %18 = arith.addf %15, %17 : vector<4x8x8xf32>
    %cst_13 = arith.constant dense<0xFF800000> : vector<4x8xf32>
    %19 = vector.multi_reduction <maximumf>, %18, %cst_13 [2] : vector<4x8x8xf32> to vector<4x8xf32>
    %20 = vector.shape_cast %19 : vector<4x8xf32> to vector<4x8x1xf32>
    %21 = vector.broadcast %20 : vector<4x8x1xf32> to vector<4x8x8xf32>
    %22 = arith.subf %18, %21 : vector<4x8x8xf32>
    %23 = math.exp %22 : vector<4x8x8xf32>
    %cst_14 = arith.constant dense<0.000000e+00> : vector<4x8xf32>
    %24 = vector.multi_reduction <add>, %23, %cst_14 [2] : vector<4x8x8xf32> to vector<4x8xf32>
    %25 = vector.shape_cast %24 : vector<4x8xf32> to vector<4x8x1xf32>
    "tpu.trace_start"() <{level = 10 : i32, message = "hqk,hkd->hqd"}> : () -> ()
    %cst_15 = arith.constant dense<0.000000e+00> : vector<4x8x8xf32>
    %26 = tpu.matmul %23, %8, %cst_15 {dimension_numbers = #tpu.dot_dimension_numbers<[2], [1], [1], [2], [0, 0, 0, 1, 1, 2], [0], [0]>} : vector<4x8x8xf32>, vector<4x8x8xf32>, vector<4x8x8xf32> -> vector<4x8x8xf32>
    "tpu.trace_stop"() : () -> ()
    %27 = tpu.reciprocal %25 {approx = true} : vector<4x8x1xf32> -> vector<4x8x1xf32>
    %28 = vector.broadcast %27 : vector<4x8x1xf32> to vector<4x8x8xf32>
    %29 = arith.mulf %26, %28 : vector<4x8x8xf32>
    %30 = tpu.transpose %29, [1, 0, 2] : vector<4x8x8xf32> -> vector<8x4x8xf32>
    %31 = vector.shape_cast %30 : vector<8x4x8xf32> to vector<8x32xf32>
    %c0_16 = arith.constant 0 : index
    %c0_17 = arith.constant 0 : index
    %c0_18 = arith.constant 0 : index
    %32 = vector.load %arg6[%c0_16, %c0_17, %c0_18] : memref<1x8x32xf32, #tpu.memory_space<vmem>>, vector<1x8x32xf32>
    %33 = vector.shape_cast %32 : vector<1x8x32xf32> to vector<8x32xf32>
    %34 = vector.shape_cast %31 : vector<8x32xf32> to vector<1x8x32xf32>
    tpu.vector_store %arg6[%c0_16, %c0_17, %c0_18], %34 {strides = array<i32>} : memref<1x8x32xf32, #tpu.memory_space<vmem>>, vector<1x8x32xf32>,
    return
  }
  func.func @transform_0(%arg0: i32, %arg1: i32) -> (i32, i32, i32) {
    %c0_i32 = arith.constant 0 : i32
    %c0_i32_0 = arith.constant 0 : i32
    %c0_i32_1 = arith.constant 0 : i32
    return %arg0, %c0_i32, %c0_i32_0 : i32, i32, i32
  }
  func.func @transform_1(%arg0: i32, %arg1: i32) -> (i32, i32, i32) {
    %c0_i32 = arith.constant 0 : i32
    %c0_i32_0 = arith.constant 0 : i32
    %c0_i32_1 = arith.constant 0 : i32
    return %arg0, %c0_i32, %c0_i32_0 : i32, i32, i32
  }
  func.func @transform_2(%arg0: i32, %arg1: i32) -> (i32, i32) {
    %c0_i32 = arith.constant 0 : i32
    %c0_i32_0 = arith.constant 0 : i32
    %c0_i32_1 = arith.constant 0 : i32
    return %c0_i32, %c0_i32_0 : i32, i32
  }
  func.func @transform_3(%arg0: i32, %arg1: i32) -> (i32, i32) {
    %c0_i32 = arith.constant 0 : i32
    %c0_i32_0 = arith.constant 0 : i32
    %c0_i32_1 = arith.constant 0 : i32
    return %c0_i32, %c0_i32_0 : i32, i32
  }
  func.func @transform_4(%arg0: i32, %arg1: i32) -> (i32, i32, i32) {
    %c0_i32 = arith.constant 0 : i32
    %c0_i32_0 = arith.constant 0 : i32
    return %arg0, %arg1, %c0_i32 : i32, i32, i32
  }
}

</mosaic_0001>

<bundles_post_ra>
// kernel: tpu_custom_call.1
= control target key start
LH: loop header
LB: loop body
LE: loop exit
PB: predicated region body
PF: predicated region fallthrough
CT: control target
= control target key end

     0   :  { %s2532_s0 = inlined_call_operand.hbm [shape: f32[2,8,32], index: 0, kind: input, shape index: {}]   ;;  %s2533_s1 = inlined_call_operand.hbm [shape: f32[2,1,8], index: 1, kind: input, shape index: {}]   ;;  %s2534_s2 = inlined_call_operand.hbm [shape: f32[32,96], index: 2, kind: input, shape index: {}]   ;;  %s2535_s3 = inlined_call_operand.vmem [shape: f32[1,96], index: 3, kind: input, shape index: {}]   ;;  %s2536_s4 = inlined_call_operand.hbm [shape: f32[2,8,32], index: 4, kind: output, shape index: {}]  }
   0x1   :  { %2538 = sst [smem:[#allocation18_spill]] %s2532_s0 }
   0x2   :  { %2539 = sst [smem:[#allocation19_spill]] %s2534_s2 }
   0x3   :  { %9 = vsyncpa [#allocation6], 0 }
   0x4   :  { %11 = vsyncpa [#allocation6 + $0x1], 0 }
   0x5   :  { %12 = vsyncpa [#allocation9], 0 }
   0x6   :  { %14 = vsyncpa [#allocation9 + $0x1], 0 }
   0x7   :  { %15 = vsyncpa [#allocation7], 0 }
   0x8   :  { %17 = vsyncpa [#allocation7 + $0x1], 0  ;;  %s2197_s15 = smov 0   ;;  %s2199_s16 = smov 0  }
   0x9   :  { %s2201_s17 = smov 0   ;;  %s2203_s18 = smov 0  }
   0xa   :  { %s2205_s19 = smov 0   ;;  %s2207_s20 = smov 0  }
   0xb LB: > { %s2228_s21 = sadd.s32 4294967295, %s2152_s20   ;;  %s1765_s22 = sadd.s32 4294967294, %s2152_s20   ;;  %s2152_s20 = sphi %s2207_s20, %s23_s20   ;;  %s2148_s19 = sphi %s2205_s19, %s2559_s19   ;;  %s2144_s18 = sphi %s2203_s18, %s2558_s18   ;;  %s2140_s17 = sphi %s2201_s17, %s2557_s17   ;;  %s2136_s16 = sphi %s2199_s16, %s2556_s16   ;;  %s2132_s15 = sphi %s2197_s15, %s2555_s15  }
   0xc   : > { %p55_p0 = scmp.ne.s32.totalorder %s2136_s16, %s2132_s15  ;;  %p56_p1 = scmp.eq.s32.totalorder %s2228_s21, 0 }
   0xd   : > { %p155_p3 = scmp.eq.s32.totalorder %s1765_s22, 1  ;;  %p1766_p5 = scmp.ge.s32.totalorder %s2152_s20, 1 }
   0xe   : > { %p2237_p4 = por %p56_p1, %p55_p0  ;;  %p162_p7 = scmp.lt.s32.totalorder %s2152_s20, 3 }
   0xf   : > { %p2242_p6 = por %p155_p3, %p55_p0  ;;  %s2154_s26 = smov [#allocation10]  }
  0x10   : > { %p2247_p8 = pnand %p1766_p5, %p162_p7  ;;  %s174_s27 = sshll.u32 %s2154_s26, 4  ;;  %s175_s27 = int_to_ptr.vmem [resolvable:$true] %s174_s27 }
  0x11   : > { %s2541_s24 = scalar_select %p2242_p6, 1, 0 }
  0x12   : > { %p1884_p9 = pneg %p2247_p8  ;;  %p1768_p10 = scmp.ge.s32.totalorder %s2152_s20, 2 }
  0x13   : > { %s35_s29 = sadd.s32 1, %s2148_s19  ;;  %s1993_s30 = scalar_lea.vmem %s175_s27, 512 }
  0x14   : > { %p2256_p11 = pnand %p1884_p9, %p56_p1  ;;  %p1994_p13 = scmp.ne.s32.totalorder %s175_s27, %s1993_s30 }
  0x15   : > { %p2001_p5 = scmp.lt.s32.totalorder %s175_s27, %s175_s27  ;;  %p2002_p7 = scmp.lt.s32.totalorder %s1993_s30, %s1993_s30 }
  0x16   : > { %p1984_p12 = pneg %p2256_p11 }
  0x17   : > { %p2003_p2 = por %p2002_p7, %p2001_p5 }
  0x18   : > { %p1996_p0 = pnand %p1994_p13, %p1984_p12 }
  0x1a   : > { %p1997_p3 = pneg %p1996_p0 }
  0x1c   : > { %p2004_p6 = pnand %p2003_p2, %p1997_p3 }
  0x1e   : > { %2007 = shalt.err (!%p2004_p6)
}
  0x1f   : > { %s2155_s5 = smov 128   ;;  %s2156_s6 = smov 8  }
  0x20   : > { %s2544_s2 = sld [smem:[#allocation19_spill]]  ;;  %p37_p2 = scmp.ge.s32.totalorder %s35_s29, 2 }
  0x21   : > { %s42_s9 = sadd.s32 1, %s2140_s17  ;;  %p49_p6 = scmp.ne.s32.totalorder %s2140_s17, %s2136_s16 }
  0x22   : > { %p50_p9 = scmp.eq.s32.totalorder %s2152_s20, 0  ;;  %s2561_s29 = smov (%p37_p2, %s35_s29), 0 }
  0x23   : > { %2545 = sst [smem:[#allocation16_spill]] %s2561_s29  ;;  %p2547_p13 = scmp.eq.s32.totalorder %s2228_s21, 1 }
  0x24   : > { %p2274_p12 = por %p50_p9, %p49_p6  ;;  %s39_s12 = ssub.s32 %s2148_s19, %s2561_s29 }
  0x25   : > { %p2280_p0 = por %p2547_p13, %p49_p6  ;;  %p40_p3 = scmp.eq.s32.totalorder %s39_s12, 0 }
  0x26   : > { %1887 = dma.hbm_to_vmem [thread:$0]  (!%p2256_p11), %s2544_s2, 512, %s175_s27, [#allocation9], %s2155_s5, %s2155_s5, %s2156_s6  }
  0x27   : > { %p1900_p11 = scmp.lt.s32.totalorder %s2152_s20, 2  ;;  %s191_s13 = sand.u32 1, %s2140_s17  }
  0x28   : > { %s1769_s14 = sshll.u32 %s191_s13, 3  ;;  %s1770_s26 = sshll.u32 %s2148_s19, 7 }
  0x29   : > { %s2289_s22 = scalar_select %p40_p3, %s2140_s17, %s42_s9  }
  0x2a   : > { %s2550_s0 = sld [smem:[#allocation18_spill]]  ;;  %s195_s5 = scalar_lea.vmem [#allocation5], %s1769_s14 }
  0x2b   : > { %2549 = sst [smem:[#allocation17_spill]] %s2289_s22  ;;  %s202_s6 = sshll.u32 %s195_s5, 4  ;;  %s203_s6 = int_to_ptr.vmem [resolvable:$true] %s202_s6 }
  0x2c   : > { %p2297_p5 = pnand %p1900_p11, %p2274_p12  ;;  %s209_s8 = sand.u32 1, %s2152_s20  }
  0x2d   : > { %s192_s12 = scalar_lea.sflag [#allocation6], %s191_s13  ;;  %s2021_s9 = scalar_lea.vmem %s203_s6, 128 }
  0x2e   : > { %p2010_p7 = pneg %p2297_p5  ;;  %p2022_p2 = scmp.ne.s32.totalorder %s203_s6, %s2021_s9 }
  0x2f   : > { %s2157_s14 = smov [#allocation5]  }
  0x30   : > { %s200_s30 = scalar_lea.hbm %s2550_s0, %s1770_s26  ;;  %p2024_p6 = pnand %p2022_p2, %p2010_p7 }
  0x31   : > { %s2026_s26 = sshll.u32 %s2157_s14, 4  ;;  %s2027_s26 = int_to_ptr.vmem [resolvable:$false] %s2026_s26 }
  0x32   : > { %p2025_p9 = pneg %p2024_p6  ;;  %s2028_s10 = scalar_lea.vmem %s2027_s26, 256 }
  0x33   : > { %p2029_p12 = scmp.lt.s32.totalorder %s203_s6, %s2027_s26  ;;  %p2030_p13 = scmp.lt.s32.totalorder %s2028_s10, %s2021_s9 }
  0x35   : > { %p2031_p11 = por %p2030_p13, %p2029_p12 }
  0x37   : > { %p2032_p3 = pnand %p2031_p11, %p2025_p9 }
  0x39   : > { %2035 = shalt.err (!%p2032_p3)
}
  0x3a   : > { %1891 = dma.hbm_to_vmem [thread:$0]  (!%p2297_p5), %s200_s30, 128, %s203_s6, %s192_s12  }
  0x3b   : > { %s1771_s27 = sshll.u32 %s2148_s19, 4  ;;  %s212_s28 = scalar_lea.vmem [#allocation8], %s191_s13 }
  0x3c   : > { %s219_s5 = sshll.u32 %s212_s28, 4  ;;  %s217_s29 = scalar_lea.hbm %s2533_s1, %s1771_s27  ;;  %s220_s5 = int_to_ptr.vmem [resolvable:$true] %s219_s5 }
  0x3d   : > { %s210_s14 = scalar_lea.sflag [#allocation9], %s209_s8  ;;  %s2049_s22 = scalar_lea.vmem %s220_s5, 16 }
  0x3e   : > { %p2050_p2 = scmp.ne.s32.totalorder %s220_s5, %s2049_s22  ;;  %s2158_s9 = smov [#allocation8]  }
  0x3f   : > { %s2054_s26 = sshll.u32 %s2158_s9, 4  ;;  %s2055_s26 = int_to_ptr.vmem [resolvable:$false] %s2054_s26 }
  0x40   : > { %p2052_p6 = pnand %p2050_p2, %p2010_p7  ;;  %s2056_s10 = scalar_lea.vmem %s2055_s26, 32 }
  0x41   : > { %p2057_p12 = scmp.lt.s32.totalorder %s220_s5, %s2055_s26  ;;  %p2058_p13 = scmp.lt.s32.totalorder %s2056_s10, %s2049_s22 }
  0x42   : > { %p2053_p9 = pneg %p2052_p6 }
  0x43   : > { %p2059_p11 = por %p2058_p13, %p2057_p12 }
  0x45   : > { %p2060_p3 = pnand %p2059_p11, %p2053_p9 }
  0x47   : > { %2063 = shalt.err (!%p2060_p3)
}
  0x48   : > { %1894 = dma.hbm_to_vmem [thread:$0]  (!%p2297_p5), %s217_s29, 16, %s220_s5, %s210_s14  }
  0x49   : > { %228 = sbr.rel (%p2247_p8) target bundleno = 1258 (0x4ea), region = 36  ;;  %s2321_s0 = sand.u32 (!%p2247_p8), 1, %s2136_s16  }
  0x4a   : > { %s1773_s2 = sshll.u32 (!%p2247_p8), %s2321_s0, 3  ;;  %s231_s13 = scalar_lea.sflag (!%p2247_p8), [#allocation6], %s2321_s0 }
  0x4b   : > { %s234_s22 = scalar_lea.vmem (!%p2247_p8), [#allocation5], %s1773_s2 }
  0x4e   : > { %2115 = dma.done.wait (%p2237_p4), %s231_s13, 128  }
  0x4f   : > { %2117 = vsyncadd (%p2237_p4), %s231_s13, 4294967168  ;;  %s239_s25 = sand.u32 1, %s2228_s21   ;;  %s242_s30 = scalar_lea.vmem [#allocation8], %s2321_s0 }
  0x50   : > { %s240_s29 = scalar_lea.sflag [#allocation9], %s239_s25 }
  0x51   : > { %2119 = dma.done.wait (%p2237_p4), %s240_s29, 16  }
  0x52   : > { %2121 = vsyncadd (%p2237_p4), %s240_s29, 4294967280 }
  0x53   : > { %2123 = dma.done.wait (%p56_p1), [#allocation9], 512  }
  0x54   : > { %2125 = vsyncadd (%p56_p1), [#allocation9], 4294966784  ;;  %v2159_v0 = vmov 0.0   ;;  %vm2160_vm0 = vmmov 0   ;;  %v283_v1 = vld [vmem:[#allocation10 + $0x18] sm:$0xff]  ;;  %v282_v2 = vld [vmem:[#allocation10 + $0x10] sm:$0xff]  ;;  %v380_v12 = vlaneseq }
  0x55   : > { %1823 = vmatprep.subr.mxu0 %v2159_v0  ;;  %1831 = vmatprep.mubr.msk.f32.mxu0 %vm2160_vm0, %v2159_v0  ;;  %v281_v3 = vld [vmem:[#allocation10 + $0x8] sm:$0xff]  ;;  %v280_v4 = vld [vmem:[#allocation10] sm:$0xff]  ;;  %vm291_vm1 = vcmask 261120   ;;  %s2161_s6 = smov 104   ;;  %s2162_s7 = smov 120   ;;  %vm511_vm2 = vcmask 64512  }
  0x56   : > { %1834 = vmatprep.subr.mxu1 %v2159_v0  ;;  %1836 = vmatprep.mubr.msk.f32.mxu1 %vm2160_vm0, %v2159_v0  ;;  %v279_v5 = vld [vmem:[%s234_s22] sm:$0xff]  ;;  %s2163_s8 = smov 96   ;;  %s2164_s12 = smov 112   ;;  %v2165_v10 = vmov 1983009808   ;;  %v2357_v16 = vshrl.u32 %v380_v12, 7 }
  0x57   : > { %1824 = vmatpush3.msra.mxu0 %v283_v1  ;;  %v1776_v6 = vld [vmem:[%s2535_s3] ss:$0 sm:$0xff]  ;;  %v378_v11 = vunpack.c.l.s4 %v2165_v10  ;;  %v2166_v13 = vmov 1934713408   ;;  %s2167_s27 = smov 64   ;;  %s2168_s28 = smov 16  }
  0x58   : > { %1825 = vmatprep.subr.mxu0 %v2159_v0  ;;  %v410_v14 = vunpack.c.l.s4 %v2166_v13  ;;  %s2169_s5 = smov 8   ;;  %s2170_s14 = smov 24   ;;  %vm1633_vm3 = vcmask 130048   ;;  %vm1635_vm4 = vcmask 195584  }
  0x59   : > { %1826 = vmatpush3.msra.mxu0 %v282_v2  ;;  %v379_v15 = vunpack.c.0.s8 %v378_v11  ;;  %s1799_s9 = sshll.u32 %s2144_s18, 7  ;;  %s274_s26 = scalar_lea.vmem [#allocation11], %s1773_s2 }
  0x5a   : > { %1827 = vmatprep.subr.mxu0 %v2159_v0  ;;  %v411_v19 = vunpack.c.0.s8 %v410_v14  ;;  %s1654_s10 = sshll.u32 %s274_s26, 4  ;;  %s2489_s25 = scalar_lea.hbm %s2536_s4, %s1799_s9  ;;  %s1655_s10 = int_to_ptr.vmem [resolvable:$true] %s1654_s10 }
  0x5b   : > { %1828 = vmatpush3.msra.mxu0 %v281_v3  ;;  %v2360_v20 = vsub.s32 %v379_v15, %v2357_v16  ;;  %s1640_s29 = scalar_lea.sflag [#allocation7], %s2321_s0  ;;  %s2171_s18 = smov [#allocation11]  }
  0x5c   : > { %1829 = vmatprep.subr.mxu0 %v2159_v0  ;;  %v2363_v26 = vsub.s32 %v411_v19, %v2357_v16  ;;  %s2068_s2 = sshll.u32 %s2171_s18, 4  ;;  %s2069_s2 = int_to_ptr.vmem [resolvable:$false] %s2068_s2 }
  0x5d   : > { %1830 = vmatpush3.msra.mxu0 %v280_v4  ;;  %s2070_s21 = scalar_lea.vmem %s2069_s2, 256  ;;  %p2071_p5 = scmp.lt.s32.totalorder %s1655_s10, %s2069_s2 }
  0x5e   : > { %1832 = vmatmul.mubr.msk.f32.vlgmr.msra.gmra.mxu0 %vm291_vm1, %v279_v5  ;;  %1844 = vmatprep.subr.mxu0 %v2159_v0 }
  0x5f   : > { %1846 = vmatprep.mubr.msk.f32.mxu0 %vm2160_vm0, %v2159_v0 }
 0x11e   : > { %v361_v7 = vpop.f32.mrf.mxu0 }
 0x11f   : > { %v362_v8 = vadd.f32 %v1776_v6, %v361_v7 }
 0x120   : > { %v1833_v9 = vpop.f32.mrf.mxu0 }
 0x121   : > { %372 = vrot.lane.b32.xlu1 %v362_v8, %s2161_s6  ;;  %366 = vrot.lane.b32.xlu0 %v362_v8, %s2162_s7 }
 0x125   : > { %516 = vrot.lane.b32.xlu1 %v362_v8, %s2163_s8  ;;  %369 = vrot.lane.b32.xlu0 %v362_v8, %s2164_s12 }
 0x193   : > { %v373_v17 = vpop.permute.xlu1 %372  ;;  %v367_v18 = vpop.permute.xlu0 %366 }
 0x194   : > { %518 = vrot.lane.b32.xlu0 %v367_v18, %s2163_s8  ;;  %v391_v21 = vcombine.low %v367_v18, %v373_v17  ;;  %v392_v22 = vcombine.high %v367_v18, %v373_v17 }
 0x196   : > { %v399_v27 = vrot.slane %v391_v21, %v2360_v20  ;;  %v406_v28 = vrot.slane %v392_v22, %v2360_v20 }
 0x197   : > { %v370_v23 = vpop.permute.xlu0 %369  ;;  %v517_v59 = vpop.permute.xlu1 %516 }
 0x198   : > { %v375_v24 = vcombine.low %v362_v8, %v370_v23  ;;  %v376_v25 = vcombine.high %v362_v8, %v370_v23  ;;  %522 = vrot.lane.b32.xlu0 %v373_v17, %s2163_s8  ;;  %520 = vrot.lane.b32.xlu1 %v370_v23, %s2163_s8 }
 0x19a   : > { %v383_v29 = vrot.slane %v375_v24, %v2360_v20  ;;  %v390_v30 = vrot.slane %v376_v25, %v2360_v20 }
 0x19c   : > { %v407_v31 = vcombine.low %v383_v29, %v399_v27  ;;  %v408_v32 = vcombine.high %v383_v29, %v399_v27  ;;  %v423_v33 = vcombine.low %v390_v30, %v406_v28  ;;  %v424_v34 = vcombine.high %v390_v30, %v406_v28  ;;  %668 = vrot.lane.b32.xlu0 %v362_v8, %s2167_s27 }
 0x19d   : > { %670 = vrot.lane.b32.xlu1 %v367_v18, %s2167_s27 }
 0x19e   : > { %v415_v35 = vrot.slane %v407_v31, %v2363_v26  ;;  %v422_v36 = vrot.slane %v408_v32, %v2363_v26  ;;  %v431_v37 = vrot.slane %v423_v33, %v2363_v26  ;;  %v438_v38 = vrot.slane %v424_v34, %v2363_v26 }
 0x1a0   : > { %v443_v39 = vcombine.low %v415_v35, %v422_v36  ;;  %v1778_v40 = vcombine.high %v415_v35, %v422_v36  ;;  %v459_v41 = vcombine.low %v431_v37, %v438_v38  ;;  %v1779_v42 = vcombine.high %v431_v37, %v438_v38  ;;  %674 = vrot.lane.b32.xlu0 %v373_v17, %s2167_s27 }
 0x1a1   : > { %672 = vrot.lane.b32.xlu1 %v370_v23, %s2167_s27 }
 0x1a2   : > { %v450_v43 = vrot.slane %v443_v39, %v2360_v20  ;;  %v458_v44 = vrot.slane %v1778_v40, %v2360_v20  ;;  %v466_v45 = vrot.slane %v459_v41, %v2360_v20  ;;  %v474_v46 = vrot.slane %v1779_v42, %v2360_v20 }
 0x1a4   : > { %v475_v47 = vcombine.low %v450_v43, %v458_v44  ;;  %v476_v48 = vcombine.high %v450_v43, %v458_v44  ;;  %v491_v49 = vcombine.low %v466_v45, %v474_v46  ;;  %v492_v50 = vcombine.high %v466_v45, %v474_v46 }
 0x1a6   : > { %v483_v51 = vrot.slane %v475_v47, %v2363_v26  ;;  %v490_v52 = vrot.slane %v476_v48, %v2363_v26  ;;  %v499_v53 = vrot.slane %v491_v49, %v2363_v26  ;;  %v506_v54 = vrot.slane %v492_v50, %v2363_v26 }
 0x1a8   : > { %v507_v55 = vcombine.low %v483_v51, %v499_v53  ;;  %v508_v56 = vcombine.high %v483_v51, %v499_v53  ;;  %v509_v57 = vcombine.low %v490_v52, %v506_v54  ;;  %v510_v58 = vcombine.high %v490_v52, %v506_v54 }
 0x1aa   : > { %512 = vst.msk [vmem:[#allocation2] sm:$0xff] %vm511_vm2, %v507_v55  ;;  %513 = vst.msk [vmem:[#allocation2 + $0x8] sm:$0xff] %vm511_vm2, %v508_v56 }
 0x1ab   : > { %514 = vst.msk [vmem:[#allocation2 + $0x10] sm:$0xff] %vm511_vm2, %v509_v57  ;;  %515 = vst.msk [vmem:[#allocation2 + $0x18] sm:$0xff] %vm511_vm2, %v510_v58 }
 0x206   : > { %v519_v60 = vpop.permute.xlu0 %518 }
 0x20a   : > { %v521_v61 = vpop.permute.xlu1 %520  ;;  %v523_v62 = vpop.permute.xlu0 %522 }
 0x20b   : > { %v528_v63 = vcombine.low %v517_v59, %v521_v61  ;;  %v529_v1 = vcombine.high %v517_v59, %v521_v61  ;;  %v544_v2 = vcombine.low %v519_v60, %v523_v62  ;;  %v545_v3 = vcombine.high %v519_v60, %v523_v62 }
 0x20d   : > { %v536_v4 = vrot.slane %v528_v63, %v2360_v20  ;;  %v543_v5 = vrot.slane %v529_v1, %v2360_v20  ;;  %v552_v6 = vrot.slane %v544_v2, %v2360_v20  ;;  %v559_v7 = vrot.slane %v545_v3, %v2360_v20 }
 0x20e   : > { %v669_v8 = vpop.permute.xlu0 %668 }
 0x20f   : > { %v560_v9 = vcombine.low %v536_v4, %v552_v6  ;;  %v561_v10 = vcombine.high %v536_v4, %v552_v6  ;;  %v576_v11 = vcombine.low %v543_v5, %v559_v7  ;;  %v577_v12 = vcombine.high %v543_v5, %v559_v7  ;;  %v671_v13 = vpop.permute.xlu1 %670 }
 0x211   : > { %v568_v14 = vrot.slane %v560_v9, %v2363_v26  ;;  %v575_v15 = vrot.slane %v561_v10, %v2363_v26  ;;  %v584_v17 = vrot.slane %v576_v11, %v2363_v26  ;;  %v591_v18 = vrot.slane %v577_v12, %v2363_v26 }
 0x212   : > { %v675_v19 = vpop.permute.xlu0 %674 }
 0x213   : > { %v596_v21 = vcombine.low %v568_v14, %v575_v15  ;;  %v1780_v22 = vcombine.high %v568_v14, %v575_v15  ;;  %v612_v23 = vcombine.low %v584_v17, %v591_v18  ;;  %v1781_v24 = vcombine.high %v584_v17, %v591_v18  ;;  %v673_v25 = vpop.permute.xlu1 %672 }
 0x214   : > { %v680_v27 = vcombine.low %v669_v8, %v673_v25  ;;  %v681_v28 = vcombine.high %v669_v8, %v673_v25  ;;  %v696_v29 = vcombine.low %v671_v13, %v675_v19  ;;  %v697_v30 = vcombine.high %v671_v13, %v675_v19  ;;  %v822_v19 = vld [vmem:[#allocation2] sm:$0xff] }
 0x215   : > { %v603_v31 = vrot.slane %v596_v21, %v2360_v20  ;;  %v611_v32 = vrot.slane %v1780_v22, %v2360_v20  ;;  %v619_v33 = vrot.slane %v612_v23, %v2360_v20  ;;  %v627_v34 = vrot.slane %v1781_v24, %v2360_v20  ;;  %v824_v21 = vld [vmem:[#allocation2 + $0x10] sm:$0xff]  ;;  %v823_v23 = vld [vmem:[#allocation2 + $0x8] sm:$0xff] }
 0x216   : > { %v688_v35 = vrot.slane %v680_v27, %v2360_v20  ;;  %v695_v36 = vrot.slane %v681_v28, %v2360_v20  ;;  %v704_v37 = vrot.slane %v696_v29, %v2360_v20  ;;  %v711_v38 = vrot.slane %v697_v30, %v2360_v20  ;;  %v825_v27 = vld [vmem:[#allocation2 + $0x18] sm:$0xff]  ;;  %v834_v29 = vld [vmem:[%s242_s30] sm:$0x1]  ;;  %s2064_s30 = scalar_lea.vmem %s1655_s10, 128 }
 0x217   : > { %v628_v39 = vcombine.low %v603_v31, %v611_v32  ;;  %v629_v40 = vcombine.high %v603_v31, %v611_v32  ;;  %v644_v41 = vcombine.low %v619_v33, %v627_v34  ;;  %v645_v42 = vcombine.high %v619_v33, %v627_v34  ;;  %p2065_p1 = scmp.ne.s32.totalorder %s1655_s10, %s2064_s30  ;;  %p2072_p7 = scmp.lt.s32.totalorder %s2070_s21, %s2064_s30 }
 0x218   : > { %v712_v43 = vcombine.low %v688_v35, %v704_v37  ;;  %v713_v44 = vcombine.high %v688_v35, %v704_v37  ;;  %v728_v45 = vcombine.low %v695_v36, %v711_v38  ;;  %v729_v46 = vcombine.high %v695_v36, %v711_v38 }
 0x219   : > { %v636_v47 = vrot.slane %v628_v39, %v2363_v26  ;;  %v643_v48 = vrot.slane %v629_v40, %v2363_v26  ;;  %v652_v49 = vrot.slane %v644_v41, %v2363_v26  ;;  %v659_v50 = vrot.slane %v645_v42, %v2363_v26  ;;  %p2066_p4 = pnand %p2065_p1, %p2280_p0  ;;  %p2073_p2 = por %p2072_p7, %p2071_p5 }
 0x21a   : > { %v720_v51 = vrot.slane %v712_v43, %v2363_v26  ;;  %v727_v52 = vrot.slane %v713_v44, %v2363_v26  ;;  %v736_v53 = vrot.slane %v728_v45, %v2363_v26  ;;  %v743_v54 = vrot.slane %v729_v46, %v2363_v26 }
 0x21b   : > { %v660_v55 = vcombine.low %v636_v47, %v652_v49  ;;  %v661_v56 = vcombine.high %v636_v47, %v652_v49  ;;  %v662_v57 = vcombine.low %v643_v48, %v659_v50  ;;  %v663_v58 = vcombine.high %v643_v48, %v659_v50  ;;  %p2067_p8 = pneg %p2066_p4 }
 0x21c   : > { %v748_v59 = vcombine.low %v720_v51, %v727_v52  ;;  %v1782_v60 = vcombine.high %v720_v51, %v727_v52  ;;  %v764_v61 = vcombine.low %v736_v53, %v743_v54  ;;  %v1783_v62 = vcombine.high %v736_v53, %v743_v54 }
 0x21d   : > { %664 = vst.msk [vmem:[#allocation3] sm:$0xff] %vm511_vm2, %v660_v55  ;;  %665 = vst.msk [vmem:[#allocation3 + $0x8] sm:$0xff] %vm511_vm2, %v661_v56  ;;  %v835_v30 = vsub.f32 1.0, %v834_v29  ;;  %v840_v32 = vsub.s32 0, %v2357_v16  ;;  %p2074_p6 = pnand %p2073_p2, %p2067_p8 }
 0x21e   : > { %666 = vst.msk [vmem:[#allocation3 + $0x10] sm:$0xff] %vm511_vm2, %v662_v57  ;;  %667 = vst.msk [vmem:[#allocation3 + $0x18] sm:$0xff] %vm511_vm2, %v663_v58  ;;  %v755_v63 = vrot.slane %v748_v59, %v2360_v20  ;;  %v763_v1 = vrot.slane %v1782_v60, %v2360_v20  ;;  %v771_v2 = vrot.slane %v764_v61, %v2360_v20 }
 0x21f   : > { %v779_v3 = vrot.slane %v1783_v62, %v2360_v20  ;;  %v836_v31 = vmul.f32 -3.4028235e+38, %v835_v30 }
 0x220   : > { %v780_v4 = vcombine.low %v755_v63, %v763_v1  ;;  %v781_v5 = vcombine.high %v755_v63, %v763_v1 }
 0x221   : > { %v796_v6 = vcombine.low %v771_v2, %v779_v3  ;;  %v797_v7 = vcombine.high %v771_v2, %v779_v3  ;;  %v841_v33 = vrot.slane %v836_v31, %v840_v32 }
 0x222   : > { %v788_v8 = vrot.slane %v780_v4, %v2363_v26  ;;  %v795_v9 = vrot.slane %v781_v5, %v2363_v26 }
 0x223   : > { %v804_v10 = vrot.slane %v796_v6, %v2363_v26  ;;  %v811_v11 = vrot.slane %v797_v7, %v2363_v26 }
 0x224   : > { %v826_v17 = vld [vmem:[#allocation3] sm:$0xff]  ;;  %v827_v22 = vld [vmem:[#allocation3 + $0x8] sm:$0xff] }
 0x225   : > { %v812_v12 = vcombine.low %v788_v8, %v804_v10  ;;  %v813_v13 = vcombine.high %v788_v8, %v804_v10  ;;  %v814_v14 = vcombine.low %v795_v9, %v811_v11  ;;  %v815_v15 = vcombine.high %v795_v9, %v811_v11  ;;  %v828_v18 = vld [vmem:[#allocation3 + $0x10] sm:$0xff]  ;;  %1835 = vmatpush3.xpose.msk.msra.mxu1 %vm511_vm2, %v826_v17  ;;  %v829_v24 = vld [vmem:[#allocation3 + $0x18] sm:$0xff] }
 0x226   : > { %1845 = vmatpush3.xpose.msk.msra.mxu0 %vm511_vm2, %v828_v18  ;;  %1839 = vmatprep.subr.mxu1 %v2159_v0 }
 0x227   : > { %816 = vst.msk [vmem:[#allocation4] sm:$0xff] %vm511_vm2, %v812_v12  ;;  %817 = vst.msk [vmem:[#allocation4 + $0x8] sm:$0xff] %vm511_vm2, %v813_v13  ;;  %1854 = vmatprep.subr.mxu0 %v2159_v0 }
 0x228   : > { %818 = vst.msk [vmem:[#allocation4 + $0x10] sm:$0xff] %vm511_vm2, %v814_v14  ;;  %819 = vst.msk [vmem:[#allocation4 + $0x18] sm:$0xff] %vm511_vm2, %v815_v15  ;;  %1837 = vmatmul.mubr.msk.f32.vlgmr.msra.gmra.mxu1 %vm511_vm2, %v822_v19 }
 0x229   : > { %1847 = vmatmul.mubr.msk.f32.vlgmr.msra.gmra.mxu0 %vm511_vm2, %v824_v21  ;;  %1840 = vmatpush3.xpose.msk.msra.mxu1 %vm511_vm2, %v827_v22 }
 0x22a   : > { %1841 = vmatprep.mubr.msk.f32.mxu1 %vm2160_vm0, %v2159_v0  ;;  %1849 = vmatprep.subr.mxu1 %v2159_v0 }
 0x22b   : > { %1856 = vmatprep.mubr.msk.f32.mxu0 %vm2160_vm0, %v2159_v0 }
 0x22c   : > { %1842 = vmatmul.mubr.msk.f32.vlgmr.msra.gmra.mxu1 %vm511_vm2, %v823_v23 }
 0x22d   : > { %1850 = vmatpush3.xpose.msk.msra.mxu1 %vm511_vm2, %v829_v24  ;;  %1851 = vmatprep.mubr.msk.f32.mxu1 %vm2160_vm0, %v2159_v0 }
 0x22e   : > { %v830_v25 = vld [vmem:[#allocation4] sm:$0xff]  ;;  %1859 = vmatprep.subr.mxu1 %v2159_v0  ;;  %v831_v28 = vld [vmem:[#allocation4 + $0x8] sm:$0xff] }
 0x22f   : > { %1855 = vmatpush3.msra.mxu0 %v830_v25  ;;  %v832_v62 = vld [vmem:[#allocation4 + $0x10] sm:$0xff]  ;;  %v833_v3 = vld [vmem:[#allocation4 + $0x18] sm:$0xff] }
 0x230   : > { %1864 = vmatprep.subr.mxu0 %v2159_v0  ;;  %1852 = vmatmul.mubr.msk.f32.vlgmr.msra.gmra.mxu1 %vm511_vm2, %v825_v27 }
 0x231   : > { %1860 = vmatpush3.msra.mxu1 %v831_v28  ;;  %1861 = vmatprep.mubr.msk.f32.mxu1 %vm2160_vm0, %v2159_v0 }
 0x232   : > { %1869 = vmatprep.subr.mxu1 %v2159_v0 }
 0x2e8   : > { %v916_v34 = vpop.f32.mrf.mxu1 }
 0x2e9   : > { %v1068_v35 = vpop.f32.mrf.mxu0  ;;  %v917_v36 = vadd.f32 %v916_v34, %v841_v33 }
 0x2ea   : > { %v1838_v37 = vpop.f32.mrf.mxu1  ;;  %v1069_v39 = vadd.f32 %v1068_v35, %v841_v33 }
 0x2eb   : > { %v1848_v38 = vpop.f32.mrf.mxu0  ;;  %v1148_v40 = vsel %vm511_vm2, %v917_v36, -inf }
 0x2ec   : > { %1149 = vmax.xlane.f32.xlu1 %v1148_v40  ;;  %v992_v41 = vpop.f32.mrf.mxu1  ;;  %v1154_v45 = vsel %vm511_vm2, %v1069_v39, -inf }
 0x2ed   : > { %v993_v42 = vadd.f32 %v992_v41, %v841_v33 }
 0x2ee   : > { %v1843_v43 = vpop.f32.mrf.mxu1 }
 0x2ef   : > { %v1151_v44 = vsel %vm511_vm2, %v993_v42, -inf }
 0x2f0   : > { %1152 = vmax.xlane.f32.xlu0 %v1151_v44  ;;  %v1144_v46 = vpop.f32.mrf.mxu1  ;;  %1155 = vmax.xlane.f32.xlu1 %v1154_v45 }
 0x2f1   : > { %v1145_v16 = vadd.f32 %v1144_v46, %v841_v33 }
 0x2f2   : > { %v1853_v47 = vpop.f32.mrf.mxu1 }
 0x2f3   : > { %v1157_v48 = vsel %vm511_vm2, %v1145_v16, -inf }
 0x2f4   : > { %1158 = vmax.xlane.f32.xlu0 %v1157_v48 }
 0x375   : > { %v1150_v49 = vpop.xlane.xlu1 %1149 }
 0x376   : > { %v1160_v50 = vsub.f32 %v917_v36, %v1150_v49 }
 0x378   : > { %v1164_v51 = vmul.f32 1.442695, %v1160_v50 }
 0x379   : > { %v1153_v52 = vpop.xlane.xlu0 %1152  ;;  %v1156_v53 = vpop.xlane.xlu1 %1155 }
 0x37a   : > { %1966 = vpow2.f32 %v1164_v51  ;;  %v1161_v54 = vsub.f32 %v993_v42, %v1153_v52  ;;  %v1162_v55 = vsub.f32 %v1069_v39, %v1156_v53 }
 0x37c   : > { %v1166_v56 = vmul.f32 1.442695, %v1161_v54  ;;  %v1168_v57 = vmul.f32 1.442695, %v1162_v55 }
 0x37d   : > { %v1159_v58 = vpop.xlane.xlu0 %1158 }
 0x37e   : > { %1968 = vpow2.f32 %v1166_v56  ;;  %v1163_v59 = vsub.f32 %v1145_v16, %v1159_v58 }
 0x37f   : > { %1970 = vpow2.f32 %v1168_v57 }
 0x380   : > { %v1170_v60 = vmul.f32 1.442695, %v1163_v59 }
 0x382   : > { %1972 = vpow2.f32 %v1170_v60 }
 0x387   : > { %v1967_v61 = vpop.eup %1966 }
 0x388   : > { %1857 = vmatmul.mubr.msk.f32.vlgmr.msra.gmra.mxu0 %vm511_vm2, %v1967_v61  ;;  %v1172_v63 = vsel %vm511_vm2, %v1967_v61, 0.0 }
 0x389   : > { %1865 = vmatpush3.msra.mxu0 %v832_v62  ;;  %1173 = vadd.xlane.f32.xlu0 %v1172_v63 }
 0x38a   : > { %1866 = vmatprep.mubr.msk.f32.mxu0 %vm2160_vm0, %v2159_v0 }
 0x38b   : > { %v1969_v1 = vpop.eup %1968 }
 0x38c   : > { %v1971_v2 = vpop.eup %1970  ;;  %1862 = vmatmul.mubr.msk.f32.vlgmr.msra.gmra.mxu1 %vm511_vm2, %v1969_v1  ;;  %v1175_v4 = vsel %vm511_vm2, %v1969_v1, 0.0 }
 0x38d   : > { %1867 = vmatmul.mubr.msk.f32.vlgmr.msra.gmra.mxu0 %vm511_vm2, %v1971_v2  ;;  %1870 = vmatpush3.msra.mxu1 %v833_v3  ;;  %v1178_v5 = vsel %vm511_vm2, %v1971_v2, 0.0 }
 0x38e   : > { %1176 = vadd.xlane.f32.xlu1 %v1175_v4  ;;  %1179 = vadd.xlane.f32.xlu0 %v1178_v5 }
 0x38f   : > { %v1973_v6 = vpop.eup %1972  ;;  %1871 = vmatprep.mubr.msk.f32.mxu1 %vm2160_vm0, %v2159_v0 }
 0x390   : > { %1872 = vmatmul.mubr.msk.f32.vlgmr.msra.gmra.mxu1 %vm511_vm2, %v1973_v6  ;;  %v1181_v7 = vsel %vm511_vm2, %v1973_v6, 0.0 }
 0x392   : > { %1182 = vadd.xlane.f32.xlu1 %v1181_v7 }
 0x412   : > { %v1174_v8 = vpop.xlane.xlu0 %1173 }
 0x417   : > { %v1177_v9 = vpop.xlane.xlu1 %1176  ;;  %v1180_v10 = vpop.xlane.xlu0 %1179 }
 0x418   : > { %1974 = vrcp.f32 %v1180_v10 }
 0x419   : > { %1976 = vrcp.f32 %v1174_v8 }
 0x41a   : > { %1978 = vrcp.f32 %v1177_v9 }
 0x41b   : > { %v1183_v11 = vpop.xlane.xlu1 %1182 }
 0x41c   : > { %1980 = vrcp.f32 %v1183_v11 }
 0x425   : > { %v1975_v15 = vpop.eup %1974 }
 0x426   : > { %v1977_v18 = vpop.eup %1976 }
 0x427   : > { %v1979_v21 = vpop.eup %1978 }
 0x429   : > { %v1981_v24 = vpop.eup %1980 }
 0x448   : > { %v1253_v12 = vpop.f32.mrf.mxu0 }
 0x449   : > { %v1480_v22 = vmul.f32 %v1977_v18, %v1253_v12 }
 0x44a   : > { %v1858_v13 = vpop.f32.mrf.mxu0 }
 0x44c   : > { %v1326_v14 = vpop.f32.mrf.mxu1 }
 0x44d   : > { %v1399_v17 = vpop.f32.mrf.mxu0  ;;  %v1481_v27 = vmul.f32 %v1979_v21, %v1326_v14 }
 0x44e   : > { %v1482_v0 = vmul.f32 %v1975_v15, %v1399_v17  ;;  %v1863_v19 = vpop.f32.mrf.mxu1 }
 0x44f   : > { %v1868_v23 = vpop.f32.mrf.mxu0 }
 0x450   : > { %v1472_v25 = vpop.f32.mrf.mxu1  ;;  %v1484_v28 = vcombine.low %v1480_v22, %v1482_v0  ;;  %v1485_v29 = vcombine.high %v1480_v22, %v1482_v0 }
 0x451   : > { %v1483_v30 = vmul.f32 %v1981_v24, %v1472_v25 }
 0x452   : > { %v1873_v31 = vpop.f32.mrf.mxu1  ;;  %v1492_v34 = vrot.slane %v1484_v28, %v2360_v20  ;;  %v1499_v35 = vrot.slane %v1485_v29, %v2360_v20 }
 0x453   : > { %v1500_v32 = vcombine.low %v1481_v27, %v1483_v30  ;;  %v1501_v33 = vcombine.high %v1481_v27, %v1483_v30 }
 0x455   : > { %v1508_v36 = vrot.slane %v1500_v32, %v2360_v20  ;;  %v1515_v37 = vrot.slane %v1501_v33, %v2360_v20 }
 0x457   : > { %v1516_v38 = vcombine.low %v1492_v34, %v1508_v36  ;;  %v1517_v39 = vcombine.high %v1492_v34, %v1508_v36  ;;  %v1532_v40 = vcombine.low %v1499_v35, %v1515_v37  ;;  %v1533_v41 = vcombine.high %v1499_v35, %v1515_v37 }
 0x459   : > { %v1524_v42 = vrot.slane %v1516_v38, %v2363_v26  ;;  %v1531_v43 = vrot.slane %v1517_v39, %v2363_v26  ;;  %v1540_v44 = vrot.slane %v1532_v40, %v2363_v26  ;;  %v1547_v45 = vrot.slane %v1533_v41, %v2363_v26 }
 0x45b   : > { %v1552_v46 = vcombine.low %v1524_v42, %v1531_v43  ;;  %v1796_v16 = vcombine.high %v1524_v42, %v1531_v43  ;;  %v1568_v47 = vcombine.low %v1540_v44, %v1547_v45  ;;  %v1797_v48 = vcombine.high %v1540_v44, %v1547_v45 }
 0x45d   : > { %v1559_v49 = vrot.slane %v1552_v46, %v2360_v20  ;;  %v1567_v50 = vrot.slane %v1796_v16, %v2360_v20  ;;  %v1575_v51 = vrot.slane %v1568_v47, %v2360_v20  ;;  %v1583_v52 = vrot.slane %v1797_v48, %v2360_v20 }
 0x45f   : > { %v1585_v53 = vcombine.high %v1559_v49, %v1567_v50  ;;  %v1601_v54 = vcombine.high %v1575_v51, %v1583_v52  ;;  %v1584_v55 = vcombine.low %v1559_v49, %v1567_v50  ;;  %v1600_v56 = vcombine.low %v1575_v51, %v1583_v52 }
 0x461   : > { %v1599_v57 = vrot.slane %v1585_v53, %v2363_v26  ;;  %v1615_v58 = vrot.slane %v1601_v54, %v2363_v26  ;;  %v1592_v59 = vrot.slane %v1584_v55, %v2363_v26  ;;  %v1608_v60 = vrot.slane %v1600_v56, %v2363_v26 }
 0x463   : > { %v1618_v61 = vcombine.low %v1599_v57, %v1615_v58  ;;  %v1617_v62 = vcombine.high %v1592_v59, %v1608_v60  ;;  %v1616_v63 = vcombine.low %v1592_v59, %v1608_v60  ;;  %v1619_v20 = vcombine.high %v1599_v57, %v1615_v58 }
 0x465   : > { %1625 = vrot.lane.b32.xlu1 %v1618_v61, %s2168_s28  ;;  %1621 = vrot.lane.b32.xlu0 %v1617_v62, %s2169_s5 }
 0x469   : > { %1629 = vrot.lane.b32.xlu1 %v1619_v20, %s2170_s14 }
 0x4d7   : > { %v1626_v1 = vpop.permute.xlu1 %1625  ;;  %v1622_v2 = vpop.permute.xlu0 %1621 }
 0x4d8   : > { %v1632_v3 = vsel %vm511_vm2, %v1616_v63, %v1622_v2 }
 0x4d9   : > { %v1634_v4 = vsel %vm1633_vm3, %v1632_v3, %v1626_v1 }
 0x4db   : > { %v1630_v26 = vpop.permute.xlu1 %1629 }
 0x4dc   : > { %v1636_v5 = vsel %vm1635_vm4, %v1634_v4, %v1630_v26 }
 0x4dd   : > { %1638 = vst.msk [vmem:[%s274_s26] sm:$0xff] %vm291_vm1, %v1636_v5 }
 0x4de   : > { %2077 = shalt.err (!%p2074_p6)
}
 0x4df   : > { %s2078_s23 = scalar_lea.hbm %s2489_s25, 128  ;;  %s2082_s7 = scalar_lea.hbm %s2536_s4, 256 }
 0x4e0   : > { %p2079_p9 = scmp.ne.s32.totalorder %s2489_s25, %s2078_s23  ;;  %p2083_p11 = scmp.lt.s32.totalorder %s2489_s25, %s2536_s4 }
 0x4e1   : > { %p2084_p3 = scmp.lt.s32.totalorder %s2082_s7, %s2078_s23 }
 0x4e2   : > { %p2080_p12 = pnand %p2079_p9, %p2280_p0 }
 0x4e3   : > { %p2085_p1 = por %p2084_p3, %p2083_p11 }
 0x4e4   : > { %p2081_p13 = pneg %p2080_p12 }
 0x4e6   : > { %p2086_p4 = pnand %p2085_p1, %p2081_p13 }
 0x4e8   : > { %2089 = shalt.err (!%p2086_p4)
}
 0x4e9   : > { %1882 = dma.vmem_to_hbm [thread:$0]  (%p2280_p0), %s1655_s10, 128, %s2489_s25, %s1640_s29  }
 0x4ea PF: > { %s1666_s27 = sand.u32 1, %s2132_s15   ;;  %p2552_p8 = scmp.ne.s32.totalorder %s2541_s24, 0 }
 0x4eb   : > { %s1667_s28 = scalar_lea.sflag [#allocation7], %s1666_s27 }
 0x4ec   : > { %p1896_p5 = pnand %p1768_p10, %p2552_p8 }
 0x4ee   : > { %p1897_p7 = pneg %p1896_p5 }
 0x4f0   : > { %2127 = dma.done.wait (%p1897_p7), %s1667_s28, 128  }
 0x4f1   : > { %2129 = vsyncadd (%p1897_p7), %s1667_s28, 4294967168  ;;  %s23_s20 = sadd.s32 1, %s2152_s20   ;;  %s2553_s11 = sld [smem:[#allocation17_spill]] }
 0x4f2   : > { %p20_p2 = scmp.ge.s32.totalorder %s23_s20, 4   ;;  %s2554_s5 = sld [smem:[#allocation16_spill]] }
 0x4f3   : > { %s2555_s15 = smov %s2136_s16  ;;  %s2556_s16 = smov %s2140_s17 }
 0x4f4   : > { %s2558_s18 = smov %s2148_s19  ;;  %22 = sbr.rel (!%p20_p2) target bundleno = 11 (0xb), region = 103 }
 0x4f7   : > { %s2557_s17 = smov %s2553_s11 }
 0x4f8   : > { %s2559_s19 = smov %s2554_s5 }
 0x4f9   :  { %1672 = vsyncpa [#allocation6], 1 }
 0x4fa   :  { %1674 = vsyncpa [#allocation6 + $0x1], 1 }
 0x4fb   :  { %1675 = vsyncpa [#allocation9], 1 }
 0x4fc   :  { %1677 = vsyncpa [#allocation9 + $0x1], 1 }
 0x4fd   :  { %1678 = vsyncpa [#allocation7], 1 }
 0x4fe   :  { %1680 = vsyncpa [#allocation7 + $0x1], 1 }

// kernel: tpu_custom_call.1
= control target key start
LH: loop header
LB: loop body
LE: loop exit
PB: predicated region body
PF: predicated region fallthrough
CT: control target
= control target key end

     0   :  { %s2532_s0 = inlined_call_operand.hbm [shape: f32[2,8,32], index: 0, kind: input, shape index: {}]   ;;  %s2533_s1 = inlined_call_operand.hbm [shape: f32[2,1,8], index: 1, kind: input, shape index: {}]   ;;  %s2534_s2 = inlined_call_operand.hbm [shape: f32[32,96], index: 2, kind: input, shape index: {}]   ;;  %s2535_s3 = inlined_call_operand.vmem [shape: f32[1,96], index: 3, kind: input, shape index: {}]   ;;  %s2536_s4 = inlined_call_operand.hbm [shape: f32[2,8,32], index: 4, kind: output, shape index: {}]  }
   0x1   :  { %2538 = sst [smem:[#allocation18_spill]] %s2532_s0 }
   0x2   :  { %2539 = sst [smem:[#allocation19_spill]] %s2534_s2 }
   0x3   :  { %9 = vsyncpa [#allocation6], 0 }
   0x4   :  { %11 = vsyncpa [#allocation6 + $0x1], 0 }
   0x5   :  { %12 = vsyncpa [#allocation9], 0 }
   0x6   :  { %14 = vsyncpa [#allocation9 + $0x1], 0 }
   0x7   :  { %15 = vsyncpa [#allocation7], 0 }
   0x8   :  { %17 = vsyncpa [#allocation7 + $0x1], 0  ;;  %s2197_s15 = smov 0   ;;  %s2199_s16 = smov 0  }
   0x9   :  { %s2201_s17 = smov 0   ;;  %s2203_s18 = smov 0  }
   0xa   :  { %s2205_s19 = smov 0   ;;  %s2207_s20 = smov 0  }
   0xb LB: > { %s2228_s21 = sadd.s32 4294967295, %s2152_s20   ;;  %s1765_s22 = sadd.s32 4294967294, %s2152_s20   ;;  %s2152_s20 = sphi %s2207_s20, %s23_s20   ;;  %s2148_s19 = sphi %s2205_s19, %s2559_s19   ;;  %s2144_s18 = sphi %s2203_s18, %s2558_s18   ;;  %s2140_s17 = sphi %s2201_s17, %s2557_s17   ;;  %s2136_s16 = sphi %s2199_s16, %s2556_s16   ;;  %s2132_s15 = sphi %s2197_s15, %s2555_s15  }
   0xc   : > { %p55_p0 = scmp.ne.s32.totalorder %s2136_s16, %s2132_s15  ;;  %p56_p1 = scmp.eq.s32.totalorder %s2228_s21, 0 }
   0xd   : > { %p155_p3 = scmp.eq.s32.totalorder %s1765_s22, 1  ;;  %p1766_p5 = scmp.ge.s32.totalorder %s2152_s20, 1 }
   0xe   : > { %p2237_p4 = por %p56_p1, %p55_p0  ;;  %p162_p7 = scmp.lt.s32.totalorder %s2152_s20, 3 }
   0xf   : > { %p2242_p6 = por %p155_p3, %p55_p0  ;;  %s2154_s26 = smov [#allocation10]  }
  0x10   : > { %p2247_p8 = pnand %p1766_p5, %p162_p7  ;;  %s174_s27 = sshll.u32 %s2154_s26, 4  ;;  %s175_s27 = int_to_ptr.vmem [resolvable:$true] %s174_s27 }
  0x11   : > { %s2541_s24 = scalar_select %p2242_p6, 1, 0 }
  0x12   : > { %p1884_p9 = pneg %p2247_p8  ;;  %p1768_p10 = scmp.ge.s32.totalorder %s2152_s20, 2 }
  0x13   : > { %s35_s29 = sadd.s32 1, %s2148_s19  ;;  %s1993_s30 = scalar_lea.vmem %s175_s27, 512 }
  0x14   : > { %p2256_p11 = pnand %p1884_p9, %p56_p1  ;;  %p1994_p13 = scmp.ne.s32.totalorder %s175_s27, %s1993_s30 }
  0x15   : > { %p2001_p5 = scmp.lt.s32.totalorder %s175_s27, %s175_s27  ;;  %p2002_p7 = scmp.lt.s32.totalorder %s1993_s30, %s1993_s30 }
  0x16   : > { %p1984_p12 = pneg %p2256_p11 }
  0x17   : > { %p2003_p2 = por %p2002_p7, %p2001_p5 }
  0x18   : > { %p1996_p0 = pnand %p1994_p13, %p1984_p12 }
  0x1a   : > { %p1997_p3 = pneg %p1996_p0 }
  0x1c   : > { %p2004_p6 = pnand %p2003_p2, %p1997_p3 }
  0x1e   : > { %2007 = shalt.err (!%p2004_p6)
}
  0x1f   : > { %s2155_s5 = smov 128   ;;  %s2156_s6 = smov 8  }
  0x20   : > { %s2544_s2 = sld [smem:[#allocation19_spill]]  ;;  %p37_p2 = scmp.ge.s32.totalorder %s35_s29, 2 }
  0x21   : > { %s42_s9 = sadd.s32 1, %s2140_s17  ;;  %p49_p6 = scmp.ne.s32.totalorder %s2140_s17, %s2136_s16 }
  0x22   : > { %p50_p9 = scmp.eq.s32.totalorder %s2152_s20, 0  ;;  %s2561_s29 = smov (%p37_p2, %s35_s29), 0 }
  0x23   : > { %2545 = sst [smem:[#allocation16_spill]] %s2561_s29  ;;  %p2547_p13 = scmp.eq.s32.totalorder %s2228_s21, 1 }
  0x24   : > { %p2274_p12 = por %p50_p9, %p49_p6  ;;  %s39_s12 = ssub.s32 %s2148_s19, %s2561_s29 }
  0x25   : > { %p2280_p0 = por %p2547_p13, %p49_p6  ;;  %p40_p3 = scmp.eq.s32.totalorder %s39_s12, 0 }
  0x26   : > { %1887 = dma.hbm_to_vmem [thread:$0]  (!%p2256_p11), %s2544_s2, 512, %s175_s27, [#allocation9], %s2155_s5, %s2155_s5, %s2156_s6  }
  0x27   : > { %p1900_p11 = scmp.lt.s32.totalorder %s2152_s20, 2  ;;  %s191_s13 = sand.u32 1, %s2140_s17  }
  0x28   : > { %s1769_s14 = sshll.u32 %s191_s13, 3  ;;  %s1770_s26 = sshll.u32 %s2148_s19, 7 }
  0x29   : > { %s2289_s22 = scalar_select %p40_p3, %s2140_s17, %s42_s9  }
  0x2a   : > { %s2550_s0 = sld [smem:[#allocation18_spill]]  ;;  %s195_s5 = scalar_lea.vmem [#allocation5], %s1769_s14 }
  0x2b   : > { %2549 = sst [smem:[#allocation17_spill]] %s2289_s22  ;;  %s202_s6 = sshll.u32 %s195_s5, 4  ;;  %s203_s6 = int_to_ptr.vmem [resolvable:$true] %s202_s6 }
  0x2c   : > { %p2297_p5 = pnand %p1900_p11, %p2274_p12  ;;  %s209_s8 = sand.u32 1, %s2152_s20  }
  0x2d   : > { %s192_s12 = scalar_lea.sflag [#allocation6], %s191_s13  ;;  %s2021_s9 = scalar_lea.vmem %s203_s6, 128 }
  0x2e   : > { %p2010_p7 = pneg %p2297_p5  ;;  %p2022_p2 = scmp.ne.s32.totalorder %s203_s6, %s2021_s9 }
  0x2f   : > { %s2157_s14 = smov [#allocation5]  }
  0x30   : > { %s200_s30 = scalar_lea.hbm %s2550_s0, %s1770_s26  ;;  %p2024_p6 = pnand %p2022_p2, %p2010_p7 }
  0x31   : > { %s2026_s26 = sshll.u32 %s2157_s14, 4  ;;  %s2027_s26 = int_to_ptr.vmem [resolvable:$false] %s2026_s26 }
  0x32   : > { %p2025_p9 = pneg %p2024_p6  ;;  %s2028_s10 = scalar_lea.vmem %s2027_s26, 256 }
  0x33   : > { %p2029_p12 = scmp.lt.s32.totalorder %s203_s6, %s2027_s26  ;;  %p2030_p13 = scmp.lt.s32.totalorder %s2028_s10, %s2021_s9 }
  0x35   : > { %p2031_p11 = por %p2030_p13, %p2029_p12 }
  0x37   : > { %p2032_p3 = pnand %p2031_p11, %p2025_p9 }
  0x39   : > { %2035 = shalt.err (!%p2032_p3)
}
  0x3a   : > { %1891 = dma.hbm_to_vmem [thread:$0]  (!%p2297_p5), %s200_s30, 128, %s203_s6, %s192_s12  }
  0x3b   : > { %s1771_s27 = sshll.u32 %s2148_s19, 4  ;;  %s212_s28 = scalar_lea.vmem [#allocation8], %s191_s13 }
  0x3c   : > { %s219_s5 = sshll.u32 %s212_s28, 4  ;;  %s217_s29 = scalar_lea.hbm %s2533_s1, %s1771_s27  ;;  %s220_s5 = int_to_ptr.vmem [resolvable:$true] %s219_s5 }
  0x3d   : > { %s210_s14 = scalar_lea.sflag [#allocation9], %s209_s8  ;;  %s2049_s22 = scalar_lea.vmem %s220_s5, 16 }
  0x3e   : > { %p2050_p2 = scmp.ne.s32.totalorder %s220_s5, %s2049_s22  ;;  %s2158_s9 = smov [#allocation8]  }
  0x3f   : > { %s2054_s26 = sshll.u32 %s2158_s9, 4  ;;  %s2055_s26 = int_to_ptr.vmem [resolvable:$false] %s2054_s26 }
  0x40   : > { %p2052_p6 = pnand %p2050_p2, %p2010_p7  ;;  %s2056_s10 = scalar_lea.vmem %s2055_s26, 32 }
  0x41   : > { %p2057_p12 = scmp.lt.s32.totalorder %s220_s5, %s2055_s26  ;;  %p2058_p13 = scmp.lt.s32.totalorder %s2056_s10, %s2049_s22 }
  0x42   : > { %p2053_p9 = pneg %p2052_p6 }
  0x43   : > { %p2059_p11 = por %p2058_p13, %p2057_p12 }
  0x45   : > { %p2060_p3 = pnand %p2059_p11, %p2053_p9 }
  0x47   : > { %2063 = shalt.err (!%p2060_p3)
}
  0x48   : > { %1894 = dma.hbm_to_vmem [thread:$0]  (!%p2297_p5), %s217_s29, 16, %s220_s5, %s210_s14  }
  0x49   : > { %228 = sbr.rel (%p2247_p8) target bundleno = 1258 (0x4ea), region = 36  ;;  %s2321_s0 = sand.u32 (!%p2247_p8), 1, %s2136_s16  }
  0x4a   : > { %s1773_s2 = sshll.u32 (!%p2247_p8), %s2321_s0, 3  ;;  %s231_s13 = scalar_lea.sflag (!%p2247_p8), [#allocation6], %s2321_s0 }
  0x4b   : > { %s234_s22 = scalar_lea.vmem (!%p2247_p8), [#allocation5], %s1773_s2 }
  0x4e   : > { %2115 = dma.done.wait (%p2237_p4), %s231_s13, 128  }
  0x4f   : > { %2117 = vsyncadd (%p2237_p4), %s231_s13, 4294967168  ;;  %s239_s25 = sand.u32 1, %s2228_s21   ;;  %s242_s30 = scalar_lea.vmem [#allocation8], %s2321_s0 }
  0x50   : > { %s240_s29 = scalar_lea.sflag [#allocation9], %s239_s25 }
  0x51   : > { %2119 = dma.done.wait (%p2237_p4), %s240_s29, 16  }
  0x52   : > { %2121 = vsyncadd (%p2237_p4), %s240_s29, 4294967280 }
  0x53   : > { %2123 = dma.done.wait (%p56_p1), [#allocation9], 512  }
  0x54   : > { %2125 = vsyncadd (%p56_p1), [#allocation9], 4294966784  ;;  %v2159_v0 = vmov 0.0   ;;  %vm2160_vm0 = vmmov 0   ;;  %v283_v1 = vld [vmem:[#allocation10 + $0x18] sm:$0xff]  ;;  %v282_v2 = vld [vmem:[#allocation10 + $0x10] sm:$0xff]  ;;  %v380_v12 = vlaneseq }
  0x55   : > { %1823 = vmatprep.subr.mxu0 %v2159_v0  ;;  %1831 = vmatprep.mubr.msk.f32.mxu0 %vm2160_vm0, %v2159_v0  ;;  %v281_v3 = vld [vmem:[#allocation10 + $0x8] sm:$0xff]  ;;  %v280_v4 = vld [vmem:[#allocation10] sm:$0xff]  ;;  %vm291_vm1 = vcmask 261120   ;;  %s2161_s6 = smov 104   ;;  %s2162_s7 = smov 120   ;;  %vm511_vm2 = vcmask 64512  }
  0x56   : > { %1834 = vmatprep.subr.mxu1 %v2159_v0  ;;  %1836 = vmatprep.mubr.msk.f32.mxu1 %vm2160_vm0, %v2159_v0  ;;  %v279_v5 = vld [vmem:[%s234_s22] sm:$0xff]  ;;  %s2163_s8 = smov 96   ;;  %s2164_s12 = smov 112   ;;  %v2165_v10 = vmov 1983009808   ;;  %v2357_v16 = vshrl.u32 %v380_v12, 7 }
  0x57   : > { %1824 = vmatpush3.msra.mxu0 %v283_v1  ;;  %v1776_v6 = vld [vmem:[%s2535_s3] ss:$0 sm:$0xff]  ;;  %v378_v11 = vunpack.c.l.s4 %v2165_v10  ;;  %v2166_v13 = vmov 1934713408   ;;  %s2167_s27 = smov 64   ;;  %s2168_s28 = smov 16  }
  0x58   : > { %1825 = vmatprep.subr.mxu0 %v2159_v0  ;;  %v410_v14 = vunpack.c.l.s4 %v2166_v13  ;;  %s2169_s5 = smov 8   ;;  %s2170_s14 = smov 24   ;;  %vm1633_vm3 = vcmask 130048   ;;  %vm1635_vm4 = vcmask 195584  }
  0x59   : > { %1826 = vmatpush3.msra.mxu0 %v282_v2  ;;  %v379_v15 = vunpack.c.0.s8 %v378_v11  ;;  %s1799_s9 = sshll.u32 %s2144_s18, 7  ;;  %s274_s26 = scalar_lea.vmem [#allocation11], %s1773_s2 }
  0x5a   : > { %1827 = vmatprep.subr.mxu0 %v2159_v0  ;;  %v411_v19 = vunpack.c.0.s8 %v410_v14  ;;  %s1654_s10 = sshll.u32 %s274_s26, 4  ;;  %s2489_s25 = scalar_lea.hbm %s2536_s4, %s1799_s9  ;;  %s1655_s10 = int_to_ptr.vmem [resolvable:$true] %s1654_s10 }
  0x5b   : > { %1828 = vmatpush3.msra.mxu0 %v281_v3  ;;  %v2360_v20 = vsub.s32 %v379_v15, %v2357_v16  ;;  %s1640_s29 = scalar_lea.sflag [#allocation7], %s2321_s0  ;;  %s2171_s18 = smov [#allocation11]  }
  0x5c   : > { %1829 = vmatprep.subr.mxu0 %v2159_v0  ;;  %v2363_v26 = vsub.s32 %v411_v19, %v2357_v16  ;;  %s2068_s2 = sshll.u32 %s2171_s18, 4  ;;  %s2069_s2 = int_to_ptr.vmem [resolvable:$false] %s2068_s2 }
  0x5d   : > { %1830 = vmatpush3.msra.mxu0 %v280_v4  ;;  %s2070_s21 = scalar_lea.vmem %s2069_s2, 256  ;;  %p2071_p5 = scmp.lt.s32.totalorder %s1655_s10, %s2069_s2 }
  0x5e   : > { %1832 = vmatmul.mubr.msk.f32.vlgmr.msra.gmra.mxu0 %vm291_vm1, %v279_v5  ;;  %1844 = vmatprep.subr.mxu0 %v2159_v0 }
  0x5f   : > { %1846 = vmatprep.mubr.msk.f32.mxu0 %vm2160_vm0, %v2159_v0 }
 0x11e   : > { %v361_v7 = vpop.f32.mrf.mxu0 }
 0x11f   : > { %v362_v8 = vadd.f32 %v1776_v6, %v361_v7 }
 0x120   : > { %v1833_v9 = vpop.f32.mrf.mxu0 }
 0x121   : > { %372 = vrot.lane.b32.xlu1 %v362_v8, %s2161_s6  ;;  %366 = vrot.lane.b32.xlu0 %v362_v8, %s2162_s7 }
 0x125   : > { %516 = vrot.lane.b32.xlu1 %v362_v8, %s2163_s8  ;;  %369 = vrot.lane.b32.xlu0 %v362_v8, %s2164_s12 }
 0x193   : > { %v373_v17 = vpop.permute.xlu1 %372  ;;  %v367_v18 = vpop.permute.xlu0 %366 }
 0x194   : > { %518 = vrot.lane.b32.xlu0 %v367_v18, %s2163_s8  ;;  %v391_v21 = vcombine.low %v367_v18, %v373_v17  ;;  %v392_v22 = vcombine.high %v367_v18, %v373_v17 }
 0x196   : > { %v399_v27 = vrot.slane %v391_v21, %v2360_v20  ;;  %v406_v28 = vrot.slane %v392_v22, %v2360_v20 }
 0x197   : > { %v370_v23 = vpop.permute.xlu0 %369  ;;  %v517_v59 = vpop.permute.xlu1 %516 }
 0x198   : > { %v375_v24 = vcombine.low %v362_v8, %v370_v23  ;;  %v376_v25 = vcombine.high %v362_v8, %v370_v23  ;;  %522 = vrot.lane.b32.xlu0 %v373_v17, %s2163_s8  ;;  %520 = vrot.lane.b32.xlu1 %v370_v23, %s2163_s8 }
 0x19a   : > { %v383_v29 = vrot.slane %v375_v24, %v2360_v20  ;;  %v390_v30 = vrot.slane %v376_v25, %v2360_v20 }
 0x19c   : > { %v407_v31 = vcombine.low %v383_v29, %v399_v27  ;;  %v408_v32 = vcombine.high %v383_v29, %v399_v27  ;;  %v423_v33 = vcombine.low %v390_v30, %v406_v28  ;;  %v424_v34 = vcombine.high %v390_v30, %v406_v28  ;;  %668 = vrot.lane.b32.xlu0 %v362_v8, %s2167_s27 }
 0x19d   : > { %670 = vrot.lane.b32.xlu1 %v367_v18, %s2167_s27 }
 0x19e   : > { %v415_v35 = vrot.slane %v407_v31, %v2363_v26  ;;  %v422_v36 = vrot.slane %v408_v32, %v2363_v26  ;;  %v431_v37 = vrot.slane %v423_v33, %v2363_v26  ;;  %v438_v38 = vrot.slane %v424_v34, %v2363_v26 }
 0x1a0   : > { %v443_v39 = vcombine.low %v415_v35, %v422_v36  ;;  %v1778_v40 = vcombine.high %v415_v35, %v422_v36  ;;  %v459_v41 = vcombine.low %v431_v37, %v438_v38  ;;  %v1779_v42 = vcombine.high %v431_v37, %v438_v38  ;;  %674 = vrot.lane.b32.xlu0 %v373_v17, %s2167_s27 }
 0x1a1   : > { %672 = vrot.lane.b32.xlu1 %v370_v23, %s2167_s27 }
 0x1a2   : > { %v450_v43 = vrot.slane %v443_v39, %v2360_v20  ;;  %v458_v44 = vrot.slane %v1778_v40, %v2360_v20  ;;  %v466_v45 = vrot.slane %v459_v41, %v2360_v20  ;;  %v474_v46 = vrot.slane %v1779_v42, %v2360_v20 }
 0x1a4   : > { %v475_v47 = vcombine.low %v450_v43, %v458_v44  ;;  %v476_v48 = vcombine.high %v450_v43, %v458_v44  ;;  %v491_v49 = vcombine.low %v466_v45, %v474_v46  ;;  %v492_v50 = vcombine.high %v466_v45, %v474_v46 }
 0x1a6   : > { %v483_v51 = vrot.slane %v475_v47, %v2363_v26  ;;  %v490_v52 = vrot.slane %v476_v48, %v2363_v26  ;;  %v499_v53 = vrot.slane %v491_v49, %v2363_v26  ;;  %v506_v54 = vrot.slane %v492_v50, %v2363_v26 }
 0x1a8   : > { %v507_v55 = vcombine.low %v483_v51, %v499_v53  ;;  %v508_v56 = vcombine.high %v483_v51, %v499_v53  ;;  %v509_v57 = vcombine.low %v490_v52, %v506_v54  ;;  %v510_v58 = vcombine.high %v490_v52, %v506_v54 }
 0x1aa   : > { %512 = vst.msk [vmem:[#allocation2] sm:$0xff] %vm511_vm2, %v507_v55  ;;  %513 = vst.msk [vmem:[#allocation2 + $0x8] sm:$0xff] %vm511_vm2, %v508_v56 }
 0x1ab   : > { %514 = vst.msk [vmem:[#allocation2 + $0x10] sm:$0xff] %vm511_vm2, %v509_v57  ;;  %515 = vst.msk [vmem:[#allocation2 + $0x18] sm:$0xff] %vm511_vm2, %v510_v58 }
 0x206   : > { %v519_v60 = vpop.permute.xlu0 %518 }
 0x20a   : > { %v521_v61 = vpop.permute.xlu1 %520  ;;  %v523_v62 = vpop.permute.xlu0 %522 }
 0x20b   : > { %v528_v63 = vcombine.low %v517_v59, %v521_v61  ;;  %v529_v1 = vcombine.high %v517_v59, %v521_v61  ;;  %v544_v2 = vcombine.low %v519_v60, %v523_v62  ;;  %v545_v3 = vcombine.high %v519_v60, %v523_v62 }
 0x20d   : > { %v536_v4 = vrot.slane %v528_v63, %v2360_v20  ;;  %v543_v5 = vrot.slane %v529_v1, %v2360_v20  ;;  %v552_v6 = vrot.slane %v544_v2, %v2360_v20  ;;  %v559_v7 = vrot.slane %v545_v3, %v2360_v20 }
 0x20e   : > { %v669_v8 = vpop.permute.xlu0 %668 }
 0x20f   : > { %v560_v9 = vcombine.low %v536_v4, %v552_v6  ;;  %v561_v10 = vcombine.high %v536_v4, %v552_v6  ;;  %v576_v11 = vcombine.low %v543_v5, %v559_v7  ;;  %v577_v12 = vcombine.high %v543_v5, %v559_v7  ;;  %v671_v13 = vpop.permute.xlu1 %670 }
 0x211   : > { %v568_v14 = vrot.slane %v560_v9, %v2363_v26  ;;  %v575_v15 = vrot.slane %v561_v10, %v2363_v26  ;;  %v584_v17 = vrot.slane %v576_v11, %v2363_v26  ;;  %v591_v18 = vrot.slane %v577_v12, %v2363_v26 }
 0x212   : > { %v675_v19 = vpop.permute.xlu0 %674 }
 0x213   : > { %v596_v21 = vcombine.low %v568_v14, %v575_v15  ;;  %v1780_v22 = vcombine.high %v568_v14, %v575_v15  ;;  %v612_v23 = vcombine.low %v584_v17, %v591_v18  ;;  %v1781_v24 = vcombine.high %v584_v17, %v591_v18  ;;  %v673_v25 = vpop.permute.xlu1 %672 }
 0x214   : > { %v680_v27 = vcombine.low %v669_v8, %v673_v25  ;;  %v681_v28 = vcombine.high %v669_v8, %v673_v25  ;;  %v696_v29 = vcombine.low %v671_v13, %v675_v19  ;;  %v697_v30 = vcombine.high %v671_v13, %v675_v19  ;;  %v822_v19 = vld [vmem:[#allocation2] sm:$0xff] }
 0x215   : > { %v603_v31 = vrot.slane %v596_v21, %v2360_v20  ;;  %v611_v32 = vrot.slane %v1780_v22, %v2360_v20  ;;  %v619_v33 = vrot.slane %v612_v23, %v2360_v20  ;;  %v627_v34 = vrot.slane %v1781_v24, %v2360_v20  ;;  %v824_v21 = vld [vmem:[#allocation2 + $0x10] sm:$0xff]  ;;  %v823_v23 = vld [vmem:[#allocation2 + $0x8] sm:$0xff] }
 0x216   : > { %v688_v35 = vrot.slane %v680_v27, %v2360_v20  ;;  %v695_v36 = vrot.slane %v681_v28, %v2360_v20  ;;  %v704_v37 = vrot.slane %v696_v29, %v2360_v20  ;;  %v711_v38 = vrot.slane %v697_v30, %v2360_v20  ;;  %v825_v27 = vld [vmem:[#allocation2 + $0x18] sm:$0xff]  ;;  %v834_v29 = vld [vmem:[%s242_s30] sm:$0x1]  ;;  %s2064_s30 = scalar_lea.vmem %s1655_s10, 128 }
 0x217   : > { %v628_v39 = vcombine.low %v603_v31, %v611_v32  ;;  %v629_v40 = vcombine.high %v603_v31, %v611_v32  ;;  %v644_v41 = vcombine.low %v619_v33, %v627_v34  ;;  %v645_v42 = vcombine.high %v619_v33, %v627_v34  ;;  %p2065_p1 = scmp.ne.s32.totalorder %s1655_s10, %s2064_s30  ;;  %p2072_p7 = scmp.lt.s32.totalorder %s2070_s21, %s2064_s30 }
 0x218   : > { %v712_v43 = vcombine.low %v688_v35, %v704_v37  ;;  %v713_v44 = vcombine.high %v688_v35, %v704_v37  ;;  %v728_v45 = vcombine.low %v695_v36, %v711_v38  ;;  %v729_v46 = vcombine.high %v695_v36, %v711_v38 }
 0x219   : > { %v636_v47 = vrot.slane %v628_v39, %v2363_v26  ;;  %v643_v48 = vrot.slane %v629_v40, %v2363_v26  ;;  %v652_v49 = vrot.slane %v644_v41, %v2363_v26  ;;  %v659_v50 = vrot.slane %v645_v42, %v2363_v26  ;;  %p2066_p4 = pnand %p2065_p1, %p2280_p0  ;;  %p2073_p2 = por %p2072_p7, %p2071_p5 }
 0x21a   : > { %v720_v51 = vrot.slane %v712_v43, %v2363_v26  ;;  %v727_v52 = vrot.slane %v713_v44, %v2363_v26  ;;  %v736_v53 = vrot.slane %v728_v45, %v2363_v26  ;;  %v743_v54 = vrot.slane %v729_v46, %v2363_v26 }
 0x21b   : > { %v660_v55 = vcombine.low %v636_v47, %v652_v49  ;;  %v661_v56 = vcombine.high %v636_v47, %v652_v49  ;;  %v662_v57 = vcombine.low %v643_v48, %v659_v50  ;;  %v663_v58 = vcombine.high %v643_v48, %v659_v50  ;;  %p2067_p8 = pneg %p2066_p4 }
 0x21c   : > { %v748_v59 = vcombine.low %v720_v51, %v727_v52  ;;  %v1782_v60 = vcombine.high %v720_v51, %v727_v52  ;;  %v764_v61 = vcombine.low %v736_v53, %v743_v54  ;;  %v1783_v62 = vcombine.high %v736_v53, %v743_v54 }
 0x21d   : > { %664 = vst.msk [vmem:[#allocation3] sm:$0xff] %vm511_vm2, %v660_v55  ;;  %665 = vst.msk [vmem:[#allocation3 + $0x8] sm:$0xff] %vm511_vm2, %v661_v56  ;;  %v835_v30 = vsub.f32 1.0, %v834_v29  ;;  %v840_v32 = vsub.s32 0, %v2357_v16  ;;  %p2074_p6 = pnand %p2073_p2, %p2067_p8 }
 0x21e   : > { %666 = vst.msk [vmem:[#allocation3 + $0x10] sm:$0xff] %vm511_vm2, %v662_v57  ;;  %667 = vst.msk [vmem:[#allocation3 + $0x18] sm:$0xff] %vm511_vm2, %v663_v58  ;;  %v755_v63 = vrot.slane %v748_v59, %v2360_v20  ;;  %v763_v1 = vrot.slane %v1782_v60, %v2360_v20  ;;  %v771_v2 = vrot.slane %v764_v61, %v2360_v20 }
 0x21f   : > { %v779_v3 = vrot.slane %v1783_v62, %v2360_v20  ;;  %v836_v31 = vmul.f32 -3.4028235e+38, %v835_v30 }
 0x220   : > { %v780_v4 = vcombine.low %v755_v63, %v763_v1  ;;  %v781_v5 = vcombine.high %v755_v63, %v763_v1 }
 0x221   : > { %v796_v6 = vcombine.low %v771_v2, %v779_v3  ;;  %v797_v7 = vcombine.high %v771_v2, %v779_v3  ;;  %v841_v33 = vrot.slane %v836_v31, %v840_v32 }
 0x222   : > { %v788_v8 = vrot.slane %v780_v4, %v2363_v26  ;;  %v795_v9 = vrot.slane %v781_v5, %v2363_v26 }
 0x223   : > { %v804_v10 = vrot.slane %v796_v6, %v2363_v26  ;;  %v811_v11 = vrot.slane %v797_v7, %v2363_v26 }
 0x224   : > { %v826_v17 = vld [vmem:[#allocation3] sm:$0xff]  ;;  %v827_v22 = vld [vmem:[#allocation3 + $0x8] sm:$0xff] }
 0x225   : > { %v812_v12 = vcombine.low %v788_v8, %v804_v10  ;;  %v813_v13 = vcombine.high %v788_v8, %v804_v10  ;;  %v814_v14 = vcombine.low %v795_v9, %v811_v11  ;;  %v815_v15 = vcombine.high %v795_v9, %v811_v11  ;;  %v828_v18 = vld [vmem:[#allocation3 + $0x10] sm:$0xff]  ;;  %1835 = vmatpush3.xpose.msk.msra.mxu1 %vm511_vm2, %v826_v17  ;;  %v829_v24 = vld [vmem:[#allocation3 + $0x18] sm:$0xff] }
 0x226   : > { %1845 = vmatpush3.xpose.msk.msra.mxu0 %vm511_vm2, %v828_v18  ;;  %1839 = vmatprep.subr.mxu1 %v2159_v0 }
 0x227   : > { %816 = vst.msk [vmem:[#allocation4] sm:$0xff] %vm511_vm2, %v812_v12  ;;  %817 = vst.msk [vmem:[#allocation4 + $0x8] sm:$0xff] %vm511_vm2, %v813_v13  ;;  %1854 = vmatprep.subr.mxu0 %v2159_v0 }
 0x228   : > { %818 = vst.msk [vmem:[#allocation4 + $0x10] sm:$0xff] %vm511_vm2, %v814_v14  ;;  %819 = vst.msk [vmem:[#allocation4 + $0x18] sm:$0xff] %vm511_vm2, %v815_v15  ;;  %1837 = vmatmul.mubr.msk.f32.vlgmr.msra.gmra.mxu1 %vm511_vm2, %v822_v19 }
 0x229   : > { %1847 = vmatmul.mubr.msk.f32.vlgmr.msra.gmra.mxu0 %vm511_vm2, %v824_v21  ;;  %1840 = vmatpush3.xpose.msk.msra.mxu1 %vm511_vm2, %v827_v22 }
 0x22a   : > { %1841 = vmatprep.mubr.msk.f32.mxu1 %vm2160_vm0, %v2159_v0  ;;  %1849 = vmatprep.subr.mxu1 %v2159_v0 }
 0x22b   : > { %1856 = vmatprep.mubr.msk.f32.mxu0 %vm2160_vm0, %v2159_v0 }
 0x22c   : > { %1842 = vmatmul.mubr.msk.f32.vlgmr.msra.gmra.mxu1 %vm511_vm2, %v823_v23 }
 0x22d   : > { %1850 = vmatpush3.xpose.msk.msra.mxu1 %vm511_vm2, %v829_v24  ;;  %1851 = vmatprep.mubr.msk.f32.mxu1 %vm2160_vm0, %v2159_v0 }
 0x22e   : > { %v830_v25 = vld [vmem:[#allocation4] sm:$0xff]  ;;  %1859 = vmatprep.subr.mxu1 %v2159_v0  ;;  %v831_v28 = vld [vmem:[#allocation4 + $0x8] sm:$0xff] }
 0x22f   : > { %1855 = vmatpush3.msra.mxu0 %v830_v25  ;;  %v832_v62 = vld [vmem:[#allocation4 + $0x10] sm:$0xff]  ;;  %v833_v3 = vld [vmem:[#allocation4 + $0x18] sm:$0xff] }
 0x230   : > { %1864 = vmatprep.subr.mxu0 %v2159_v0  ;;  %1852 = vmatmul.mubr.msk.f32.vlgmr.msra.gmra.mxu1 %vm511_vm2, %v825_v27 }
 0x231   : > { %1860 = vmatpush3.msra.mxu1 %v831_v28  ;;  %1861 = vmatprep.mubr.msk.f32.mxu1 %vm2160_vm0, %v2159_v0 }
 0x232   : > { %1869 = vmatprep.subr.mxu1 %v2159_v0 }
 0x2e8   : > { %v916_v34 = vpop.f32.mrf.mxu1 }
 0x2e9   : > { %v1068_v35 = vpop.f32.mrf.mxu0  ;;  %v917_v36 = vadd.f32 %v916_v34, %v841_v33 }
 0x2ea   : > { %v1838_v37 = vpop.f32.mrf.mxu1  ;;  %v1069_v39 = vadd.f32 %v1068_v35, %v841_v33 }
 0x2eb   : > { %v1848_v38 = vpop.f32.mrf.mxu0  ;;  %v1148_v40 = vsel %vm511_vm2, %v917_v36, -inf }
 0x2ec   : > { %1149 = vmax.xlane.f32.xlu1 %v1148_v40  ;;  %v992_v41 = vpop.f32.mrf.mxu1  ;;  %v1154_v45 = vsel %vm511_vm2, %v1069_v39, -inf }
 0x2ed   : > { %v993_v42 = vadd.f32 %v992_v41, %v841_v33 }
 0x2ee   : > { %v1843_v43 = vpop.f32.mrf.mxu1 }
 0x2ef   : > { %v1151_v44 = vsel %vm511_vm2, %v993_v42, -inf }
 0x2f0   : > { %1152 = vmax.xlane.f32.xlu0 %v1151_v44  ;;  %v1144_v46 = vpop.f32.mrf.mxu1  ;;  %1155 = vmax.xlane.f32.xlu1 %v1154_v45 }
 0x2f1   : > { %v1145_v16 = vadd.f32 %v1144_v46, %v841_v33 }
 0x2f2   : > { %v1853_v47 = vpop.f32.mrf.mxu1 }
 0x2f3   : > { %v1157_v48 = vsel %vm511_vm2, %v1145_v16, -inf }
 0x2f4   : > { %1158 = vmax.xlane.f32.xlu0 %v1157_v48 }
 0x375   : > { %v1150_v49 = vpop.xlane.xlu1 %1149 }
 0x376   : > { %v1160_v50 = vsub.f32 %v917_v36, %v1150_v49 }
 0x378   : > { %v1164_v51 = vmul.f32 1.442695, %v1160_v50 }
 0x379   : > { %v1153_v52 = vpop.xlane.xlu0 %1152  ;;  %v1156_v53 = vpop.xlane.xlu1 %1155 }
 0x37a   : > { %1966 = vpow2.f32 %v1164_v51  ;;  %v1161_v54 = vsub.f32 %v993_v42, %v1153_v52  ;;  %v1162_v55 = vsub.f32 %v1069_v39, %v1156_v53 }
 0x37c   : > { %v1166_v56 = vmul.f32 1.442695, %v1161_v54  ;;  %v1168_v57 = vmul.f32 1.442695, %v1162_v55 }
 0x37d   : > { %v1159_v58 = vpop.xlane.xlu0 %1158 }
 0x37e   : > { %1968 = vpow2.f32 %v1166_v56  ;;  %v1163_v59 = vsub.f32 %v1145_v16, %v1159_v58 }
 0x37f   : > { %1970 = vpow2.f32 %v1168_v57 }
 0x380   : > { %v1170_v60 = vmul.f32 1.442695, %v1163_v59 }
 0x382   : > { %1972 = vpow2.f32 %v1170_v60 }
 0x387   : > { %v1967_v61 = vpop.eup %1966 }
 0x388   : > { %1857 = vmatmul.mubr.msk.f32.vlgmr.msra.gmra.mxu0 %vm511_vm2, %v1967_v61  ;;  %v1172_v63 = vsel %vm511_vm2, %v1967_v61, 0.0 }
 0x389   : > { %1865 = vmatpush3.msra.mxu0 %v832_v62  ;;  %1173 = vadd.xlane.f32.xlu0 %v1172_v63 }
 0x38a   : > { %1866 = vmatprep.mubr.msk.f32.mxu0 %vm2160_vm0, %v2159_v0 }
 0x38b   : > { %v1969_v1 = vpop.eup %1968 }
 0x38c   : > { %v1971_v2 = vpop.eup %1970  ;;  %1862 = vmatmul.mubr.msk.f32.vlgmr.msra.gmra.mxu1 %vm511_vm2, %v1969_v1  ;;  %v1175_v4 = vsel %vm511_vm2, %v1969_v1, 0.0 }
 0x38d   : > { %1867 = vmatmul.mubr.msk.f32.vlgmr.msra.gmra.mxu0 %vm511_vm2, %v1971_v2  ;;  %1870 = vmatpush3.msra.mxu1 %v833_v3  ;;  %v1178_v5 = vsel %vm511_vm2, %v1971_v2, 0.0 }
 0x38e   : > { %1176 = vadd.xlane.f32.xlu1 %v1175_v4  ;;  %1179 = vadd.xlane.f32.xlu0 %v1178_v5 }
 0x38f   : > { %v1973_v6 = vpop.eup %1972  ;;  %1871 = vmatprep.mubr.msk.f32.mxu1 %vm2160_vm0, %v2159_v0 }
 0x390   : > { %1872 = vmatmul.mubr.msk.f32.vlgmr.msra.gmra.mxu1 %vm511_vm2, %v1973_v6  ;;  %v1181_v7 = vsel %vm511_vm2, %v1973_v6, 0.0 }
 0x392   : > { %1182 = vadd.xlane.f32.xlu1 %v1181_v7 }
 0x412   : > { %v1174_v8 = vpop.xlane.xlu0 %1173 }
 0x417   : > { %v1177_v9 = vpop.xlane.xlu1 %1176  ;;  %v1180_v10 = vpop.xlane.xlu0 %1179 }
 0x418   : > { %1974 = vrcp.f32 %v1180_v10 }
 0x419   : > { %1976 = vrcp.f32 %v1174_v8 }
 0x41a   : > { %1978 = vrcp.f32 %v1177_v9 }
 0x41b   : > { %v1183_v11 = vpop.xlane.xlu1 %1182 }
 0x41c   : > { %1980 = vrcp.f32 %v1183_v11 }
 0x425   : > { %v1975_v15 = vpop.eup %1974 }
 0x426   : > { %v1977_v18 = vpop.eup %1976 }
 0x427   : > { %v1979_v21 = vpop.eup %1978 }
 0x429   : > { %v1981_v24 = vpop.eup %1980 }
 0x448   : > { %v1253_v12 = vpop.f32.mrf.mxu0 }
 0x449   : > { %v1480_v22 = vmul.f32 %v1977_v18, %v1253_v12 }
 0x44a   : > { %v1858_v13 = vpop.f32.mrf.mxu0 }
 0x44c   : > { %v1326_v14 = vpop.f32.mrf.mxu1 }
 0x44d   : > { %v1399_v17 = vpop.f32.mrf.mxu0  ;;  %v1481_v27 = vmul.f32 %v1979_v21, %v1326_v14 }
 0x44e   : > { %v1482_v0 = vmul.f32 %v1975_v15, %v1399_v17  ;;  %v1863_v19 = vpop.f32.mrf.mxu1 }
 0x44f   : > { %v1868_v23 = vpop.f32.mrf.mxu0 }
 0x450   : > { %v1472_v25 = vpop.f32.mrf.mxu1  ;;  %v1484_v28 = vcombine.low %v1480_v22, %v1482_v0  ;;  %v1485_v29 = vcombine.high %v1480_v22, %v1482_v0 }
 0x451   : > { %v1483_v30 = vmul.f32 %v1981_v24, %v1472_v25 }
 0x452   : > { %v1873_v31 = vpop.f32.mrf.mxu1  ;;  %v1492_v34 = vrot.slane %v1484_v28, %v2360_v20  ;;  %v1499_v35 = vrot.slane %v1485_v29, %v2360_v20 }
 0x453   : > { %v1500_v32 = vcombine.low %v1481_v27, %v1483_v30  ;;  %v1501_v33 = vcombine.high %v1481_v27, %v1483_v30 }
 0x455   : > { %v1508_v36 = vrot.slane %v1500_v32, %v2360_v20  ;;  %v1515_v37 = vrot.slane %v1501_v33, %v2360_v20 }
 0x457   : > { %v1516_v38 = vcombine.low %v1492_v34, %v1508_v36  ;;  %v1517_v39 = vcombine.high %v1492_v34, %v1508_v36  ;;  %v1532_v40 = vcombine.low %v1499_v35, %v1515_v37  ;;  %v1533_v41 = vcombine.high %v1499_v35, %v1515_v37 }
 0x459   : > { %v1524_v42 = vrot.slane %v1516_v38, %v2363_v26  ;;  %v1531_v43 = vrot.slane %v1517_v39, %v2363_v26  ;;  %v1540_v44 = vrot.slane %v1532_v40, %v2363_v26  ;;  %v1547_v45 = vrot.slane %v1533_v41, %v2363_v26 }
 0x45b   : > { %v1552_v46 = vcombine.low %v1524_v42, %v1531_v43  ;;  %v1796_v16 = vcombine.high %v1524_v42, %v1531_v43  ;;  %v1568_v47 = vcombine.low %v1540_v44, %v1547_v45  ;;  %v1797_v48 = vcombine.high %v1540_v44, %v1547_v45 }
 0x45d   : > { %v1559_v49 = vrot.slane %v1552_v46, %v2360_v20  ;;  %v1567_v50 = vrot.slane %v1796_v16, %v2360_v20  ;;  %v1575_v51 = vrot.slane %v1568_v47, %v2360_v20  ;;  %v1583_v52 = vrot.slane %v1797_v48, %v2360_v20 }
 0x45f   : > { %v1585_v53 = vcombine.high %v1559_v49, %v1567_v50  ;;  %v1601_v54 = vcombine.high %v1575_v51, %v1583_v52  ;;  %v1584_v55 = vcombine.low %v1559_v49, %v1567_v50  ;;  %v1600_v56 = vcombine.low %v1575_v51, %v1583_v52 }
 0x461   : > { %v1599_v57 = vrot.slane %v1585_v53, %v2363_v26  ;;  %v1615_v58 = vrot.slane %v1601_v54, %v2363_v26  ;;  %v1592_v59 = vrot.slane %v1584_v55, %v2363_v26  ;;  %v1608_v60 = vrot.slane %v1600_v56, %v2363_v26 }
 0x463   : > { %v1618_v61 = vcombine.low %v1599_v57, %v1615_v58  ;;  %v1617_v62 = vcombine.high %v1592_v59, %v1608_v60  ;;  %v1616_v63 = vcombine.low %v1592_v59, %v1608_v60  ;;  %v1619_v20 = vcombine.high %v1599_v57, %v1615_v58 }
 0x465   : > { %1625 = vrot.lane.b32.xlu1 %v1618_v61, %s2168_s28  ;;  %1621 = vrot.lane.b32.xlu0 %v1617_v62, %s2169_s5 }
 0x469   : > { %1629 = vrot.lane.b32.xlu1 %v1619_v20, %s2170_s14 }
 0x4d7   : > { %v1626_v1 = vpop.permute.xlu1 %1625  ;;  %v1622_v2 = vpop.permute.xlu0 %1621 }
 0x4d8   : > { %v1632_v3 = vsel %vm511_vm2, %v1616_v63, %v1622_v2 }
 0x4d9   : > { %v1634_v4 = vsel %vm1633_vm3, %v1632_v3, %v1626_v1 }
 0x4db   : > { %v1630_v26 = vpop.permute.xlu1 %1629 }
 0x4dc   : > { %v1636_v5 = vsel %vm1635_vm4, %v1634_v4, %v1630_v26 }
 0x4dd   : > { %1638 = vst.msk [vmem:[%s274_s26] sm:$0xff] %vm291_vm1, %v1636_v5 }
 0x4de   : > { %2077 = shalt.err (!%p2074_p6)
}
 0x4df   : > { %s2078_s23 = scalar_lea.hbm %s2489_s25, 128  ;;  %s2082_s7 = scalar_lea.hbm %s2536_s4, 256 }
 0x4e0   : > { %p2079_p9 = scmp.ne.s32.totalorder %s2489_s25, %s2078_s23  ;;  %p2083_p11 = scmp.lt.s32.totalorder %s2489_s25, %s2536_s4 }
 0x4e1   : > { %p2084_p3 = scmp.lt.s32.totalorder %s2082_s7, %s2078_s23 }
 0x4e2   : > { %p2080_p12 = pnand %p2079_p9, %p2280_p0 }
 0x4e3   : > { %p2085_p1 = por %p2084_p3, %p2083_p11 }
 0x4e4   : > { %p2081_p13 = pneg %p2080_p12 }
 0x4e6   : > { %p2086_p4 = pnand %p2085_p1, %p2081_p13 }
 0x4e8   : > { %2089 = shalt.err (!%p2086_p4)
}
 0x4e9   : > { %1882 = dma.vmem_to_hbm [thread:$0]  (%p2280_p0), %s1655_s10, 128, %s2489_s25, %s1640_s29  }
 0x4ea PF: > { %s1666_s27 = sand.u32 1, %s2132_s15   ;;  %p2552_p8 = scmp.ne.s32.totalorder %s2541_s24, 0 }
 0x4eb   : > { %s1667_s28 = scalar_lea.sflag [#allocation7], %s1666_s27 }
 0x4ec   : > { %p1896_p5 = pnand %p1768_p10, %p2552_p8 }
 0x4ee   : > { %p1897_p7 = pneg %p1896_p5 }
 0x4f0   : > { %2127 = dma.done.wait (%p1897_p7), %s1667_s28, 128  }
 0x4f1   : > { %2129 = vsyncadd (%p1897_p7), %s1667_s28, 4294967168  ;;  %s23_s20 = sadd.s32 1, %s2152_s20   ;;  %s2553_s11 = sld [smem:[#allocation17_spill]] }
 0x4f2   : > { %p20_p2 = scmp.ge.s32.totalorder %s23_s20, 4   ;;  %s2554_s5 = sld [smem:[#allocation16_spill]] }
 0x4f3   : > { %s2555_s15 = smov %s2136_s16  ;;  %s2556_s16 = smov %s2140_s17 }
 0x4f4   : > { %s2558_s18 = smov %s2148_s19  ;;  %22 = sbr.rel (!%p20_p2) target bundleno = 11 (0xb), region = 103 }
 0x4f7   : > { %s2557_s17 = smov %s2553_s11 }
 0x4f8   : > { %s2559_s19 = smov %s2554_s5 }
 0x4f9   :  { %1672 = vsyncpa [#allocation6], 1 }
 0x4fa   :  { %1674 = vsyncpa [#allocation6 + $0x1], 1 }
 0x4fb   :  { %1675 = vsyncpa [#allocation9], 1 }
 0x4fc   :  { %1677 = vsyncpa [#allocation9 + $0x1], 1 }
 0x4fd   :  { %1678 = vsyncpa [#allocation7], 1 }
 0x4fe   :  { %1680 = vsyncpa [#allocation7 + $0x1], 1 }

</bundles_post_ra>
